<compile_context>
chip_gen: v6e
topology: v6e:2x2x1
jax: 0.10.0
libtpu: 0.0.40
codegen_flags: <defaults>
</compile_context>

<pallas_src>
import jax
import jax.numpy as jnp
from jax.experimental import pallas as pl
from jax.experimental.pallas import tpu as pltpu  # noqa: F401  (kept for parity / future use)


# ----------------------------- fused model kernel -----------------------------
def make_lstm_model_kernel(n_layers, T, B, H):
    """Fused (embedded input -> n_layers LSTM -> FC) kernel.

    Kernel ref layout (inputs, then output):
      x_ref                  (T*B, E)     time-major flat embedded input
      per layer l: wih_ref   (in, 4H)     input->gate weights, gates concatenated (i,f,g,o)
                   whh_ref   (H, 4H)      hidden->gate weights, gates concatenated
                   b_ref     (1, 4H)      b_ih + b_hh, gates concatenated
      wfc_ref                (H, O)
      bfc_ref                (1, O)
      out_ref                (B, O)
    """
    H4 = 4 * H

    def lstm_step(gpre, h, c, whh):
        # gpre: (B, 4H) input contribution incl. bias (off the recurrent chain);
        # the only chain work here is one lane-dense matmul + VPU/EUP elementwise.
        gates = gpre + jnp.dot(h, whh, preferred_element_type=jnp.float32)
        sg = jax.nn.sigmoid(gates)          # 1 EUP issue over all 128 lanes
        tg = jnp.tanh(gates)                # 1 EUP issue over all 128 lanes
        i_t = sg[:, 0:H]
        f_t = sg[:, H:2 * H]
        g_t = tg[:, 2 * H:3 * H]
        o_t = sg[:, 3 * H:4 * H]
        c_new = f_t * c + i_t * g_t
        h_new = o_t * jnp.tanh(c_new)       # 3rd EUP issue
        return h_new, c_new

    def kernel(*refs):
        x_ref = refs[0]
        wfc_ref, bfc_ref, out_ref = refs[-3], refs[-2], refs[-1]
        wih = [refs[1 + 3 * l][...] for l in range(n_layers)]
        whh = [refs[2 + 3 * l][...] for l in range(n_layers)]
        bias = [refs[3 + 3 * l][...] for l in range(n_layers)]

        # Hoisted: layer-0 input->gate contributions (+ bias) for ALL timesteps
        # as ONE (T*B, 4H) matmul; one-time reshape so per-step access is an
        # aligned [t] index.
        gih0 = (jnp.dot(x_ref[...], wih[0], preferred_element_type=jnp.float32)
                + bias[0]).reshape(T, B, H4)

        h = [jnp.zeros((B, H), jnp.float32) for _ in range(n_layers)]
        c = [jnp.zeros((B, H), jnp.float32) for _ in range(n_layers)]
        # pend[l] = pending input->gate contribution for layer l (l >= 1),
        # produced by layer l-1 in the previous wave.
        pend = [None] * n_layers

        # Wavefront schedule: wave w runs layer l at timestep t = w - l.
        # Layers processed in reverse order inside a wave so layer l consumes
        # pend[l] from the previous wave before layer l-1 overwrites it.
        for wave in range(T + n_layers - 1):
            for l in reversed(range(n_layers)):
                t = wave - l
                if t < 0 or t >= T:
                    continue
                gpre = gih0[t] if l == 0 else pend[l]
                h[l], c[l] = lstm_step(gpre, h[l], c[l], whh[l])
                if l + 1 < n_layers:
                    # Input contribution for layer l+1 at this timestep; does not
                    # depend on layer l+1's state, so it's off that layer's chain.
                    pend[l + 1] = (jnp.dot(h[l], wih[l + 1],
                                           preferred_element_type=jnp.float32)
                                   + bias[l + 1])

        # Final FC on the top layer's last-timestep hidden state.
        out_ref[...] = (jnp.dot(h[-1], wfc_ref[...],
                                preferred_element_type=jnp.float32)
                        + bfc_ref[...])

    return kernel


def lstm_model_forward(tokens, params):
    """tokens: (B, T) int32. Returns (B, output_dim) float32."""
    B, T = tokens.shape
    emb = params["embedding"]                 # (vocab, E)
    H = params["hidden_dim"]
    O = params["w_fc_t"].shape[1]
    n_layers = params["n_layers"]

    # Embedding gather directly in time-major *flat* order: kernel input is
    # already (T*B, E), so no in-kernel reshape / padded (T,B,E) tiles.
    x = emb[tokens.T.reshape(-1)]             # (T*B, E)

    args = [x]
    for l in range(n_layers):
        args += [params[f"wih_{l}"], params[f"whh_{l}"], params[f"b_{l}"]]
    args += [params["w_fc_t"], params["b_fc"]]

    out = pl.pallas_call(
        make_lstm_model_kernel(n_layers, T, B, H),
        out_shape=jax.ShapeDtypeStruct((B, O), jnp.float32),
    )(*args)
    return out.reshape(-1, O)


# --------------------------- pure-JAX reference --------------------------------
def lstm_model_reference(tokens, params):
    emb = params["embedding"]
    x = emb[tokens]                            # (B, T, E)
    B, T, _ = x.shape
    H = params["hidden_dim"]
    layer_in = jnp.transpose(x, (1, 0, 2))     # (T, B, E)
    for l in range(params["n_layers"]):
        wih = params[f"wih_{l}"]               # (in, 4H)
        whh = params[f"whh_{l}"]               # (H, 4H)
        b = params[f"b_{l}"]                   # (1, 4H)
        h = jnp.zeros((B, H), jnp.float32)
        c = jnp.zeros((B, H), jnp.float32)
        hs = []
        for t in range(T):
            gates = layer_in[t] @ wih + h @ whh + b
            i = jax.nn.sigmoid(gates[:, 0:H])
            f = jax.nn.sigmoid(gates[:, H:2 * H])
            g = jnp.tanh(gates[:, 2 * H:3 * H])
            o = jax.nn.sigmoid(gates[:, 3 * H:4 * H])
            c = f * c + i * g
            h = o * jnp.tanh(c)
            hs.append(h)
        layer_in = jnp.stack(hs, axis=0)
    out = layer_in[-1] @ params["w_fc_t"] + params["b_fc"]
    return out.reshape(-1, params["output_dim"])


# ------------------------------- param init ------------------------------------
def init_params(key, vocab, emb_dim, hidden_dim, n_layers):
    params = {"n_layers": n_layers, "output_dim": vocab, "hidden_dim": hidden_dim}
    k_emb, key = jax.random.split(key)
    params["embedding"] = jax.random.normal(k_emb, (vocab, emb_dim), jnp.float32)

    scale = 1.0 / (hidden_dim ** 0.5)
    in_dim = emb_dim
    for l in range(n_layers):
        k1, k2, k3, k4, key = jax.random.split(key, 5)
        # Gates concatenated along the last dim (PyTorch order i,f,g,o), stored
        # transposed vs. torch: wih (in, 4H), whh (H, 4H), b = b_ih + b_hh (1, 4H).
        params[f"wih_{l}"] = jax.random.uniform(
            k1, (in_dim, 4 * hidden_dim), jnp.float32, -scale, scale)
        params[f"whh_{l}"] = jax.random.uniform(
            k2, (hidden_dim, 4 * hidden_dim), jnp.float32, -scale, scale)
        b_ih = jax.random.uniform(k3, (1, 4 * hidden_dim), jnp.float32, -scale, scale)
        b_hh = jax.random.uniform(k4, (1, 4 * hidden_dim), jnp.float32, -scale, scale)
        params[f"b_{l}"] = b_ih + b_hh
        in_dim = hidden_dim

    k5, k6, _ = jax.random.split(key, 3)
    params["w_fc_t"] = jax.random.uniform(
        k5, (hidden_dim, vocab), jnp.float32, -scale, scale)
    params["b_fc"] = jax.random.uniform(k6, (1, vocab), jnp.float32, -scale, scale)
    return params


if __name__ == "__main__":
    key = jax.random.PRNGKey(0)

    VOCAB = 20       # word_emb_array.shape[0] -> output_dim
    EMB = 32         # word_emb_array.shape[1] -> embedding_dim == hidden_dim (hidden_dim=-1)
    HIDDEN = 32
    N_LAYERS = 2
    B, T = 2, 8

    k_params, k_tok = jax.random.split(key)
    params = init_params(k_params, VOCAB, EMB, HIDDEN, N_LAYERS)
    tokens = jax.random.randint(k_tok, (B, T), 0, VOCAB, dtype=jnp.int32)

    out = lstm_model_forward(tokens, params)
    out = jax.block_until_ready(out)
    assert out.shape == (B, VOCAB), out.shape

    ref = lstm_model_reference(tokens, params)
    assert jnp.allclose(out, ref, atol=1e-4, rtol=1e-4), (
        float(jnp.max(jnp.abs(out - ref))))

    print("KERNEL_OK")
</pallas_src>

<mosaic_0001>
module attributes {stable_mosaic.version = 11 : i64} {
  func.func @kernel(%arg0: memref<16x32xf32, #tpu.memory_space<vmem>>, %arg1: memref<32x128xf32, #tpu.memory_space<vmem>>, %arg2: memref<32x128xf32, #tpu.memory_space<vmem>>, %arg3: memref<1x128xf32, #tpu.memory_space<vmem>>, %arg4: memref<32x128xf32, #tpu.memory_space<vmem>>, %arg5: memref<32x128xf32, #tpu.memory_space<vmem>>, %arg6: memref<1x128xf32, #tpu.memory_space<vmem>>, %arg7: memref<32x20xf32, #tpu.memory_space<vmem>>, %arg8: memref<1x20xf32, #tpu.memory_space<vmem>>, %arg9: memref<2x20xf32, #tpu.memory_space<vmem>>) attributes {dimension_semantics = [], scalar_prefetch = 0 : i64, scratch_operands = 0 : i64, tpu.core_type = #tpu.core_type<tc>} {
    %c0 = arith.constant 0 : index
    %c0_0 = arith.constant 0 : index
    %0 = vector.load %arg1[%c0, %c0_0] : memref<32x128xf32, #tpu.memory_space<vmem>>, vector<32x128xf32>
    %c0_1 = arith.constant 0 : index
    %c0_2 = arith.constant 0 : index
    %1 = vector.load %arg4[%c0_1, %c0_2] : memref<32x128xf32, #tpu.memory_space<vmem>>, vector<32x128xf32>
    %c0_3 = arith.constant 0 : index
    %c0_4 = arith.constant 0 : index
    %2 = vector.load %arg2[%c0_3, %c0_4] : memref<32x128xf32, #tpu.memory_space<vmem>>, vector<32x128xf32>
    %c0_5 = arith.constant 0 : index
    %c0_6 = arith.constant 0 : index
    %3 = vector.load %arg5[%c0_5, %c0_6] : memref<32x128xf32, #tpu.memory_space<vmem>>, vector<32x128xf32>
    %c0_7 = arith.constant 0 : index
    %c0_8 = arith.constant 0 : index
    %4 = vector.load %arg3[%c0_7, %c0_8] : memref<1x128xf32, #tpu.memory_space<vmem>>, vector<1x128xf32>
    %c0_9 = arith.constant 0 : index
    %c0_10 = arith.constant 0 : index
    %5 = vector.load %arg6[%c0_9, %c0_10] : memref<1x128xf32, #tpu.memory_space<vmem>>, vector<1x128xf32>
    %c0_11 = arith.constant 0 : index
    %c0_12 = arith.constant 0 : index
    %6 = vector.load %arg0[%c0_11, %c0_12] : memref<16x32xf32, #tpu.memory_space<vmem>>, vector<16x32xf32>
    %cst = arith.constant dense<0.000000e+00> : vector<16x128xf32>
    %7 = tpu.matmul %6, %0, %cst {dimension_numbers = #tpu.dot_dimension_numbers<[1], [0], [0], [1], [0, 0, 1, 1], [], []>} : vector<16x32xf32>, vector<32x128xf32>, vector<16x128xf32> -> vector<16x128xf32>
    %8 = vector.broadcast %4 : vector<1x128xf32> to vector<16x128xf32>
    %9 = arith.addf %7, %8 : vector<16x128xf32>
    %10 = vector.shape_cast %9 : vector<16x128xf32> to vector<8x2x128xf32>
    %cst_13 = arith.constant 0.000000e+00 : f32
    %11 = vector.broadcast %cst_13 : f32 to vector<2x32xf32>
    %cst_14 = arith.constant 0.000000e+00 : f32
    %12 = vector.broadcast %cst_14 : f32 to vector<2x32xf32>
    %cst_15 = arith.constant 0.000000e+00 : f32
    %13 = vector.broadcast %cst_15 : f32 to vector<2x32xf32>
    %cst_16 = arith.constant 0.000000e+00 : f32
    %14 = vector.broadcast %cst_16 : f32 to vector<2x32xf32>
    %15 = vector.extract_strided_slice %10 {offsets = [0, 0, 0], sizes = [1, 2, 128], strides = [1, 1, 1]} : vector<8x2x128xf32> to vector<1x2x128xf32>
    %16 = vector.shape_cast %15 : vector<1x2x128xf32> to vector<2x128xf32>
    %cst_17 = arith.constant dense<0.000000e+00> : vector<2x128xf32>
    %17 = tpu.matmul %11, %2, %cst_17 {dimension_numbers = #tpu.dot_dimension_numbers<[1], [0], [0], [1], [0, 0, 1, 1], [], []>} : vector<2x32xf32>, vector<32x128xf32>, vector<2x128xf32> -> vector<2x128xf32>
    %18 = arith.addf %16, %17 : vector<2x128xf32>
    %19 = arith.negf %18 : vector<2x128xf32>
    %20 = math.exp %19 : vector<2x128xf32>
    %cst_18 = arith.constant 1.000000e+00 : f32
    %21 = vector.broadcast %cst_18 : f32 to vector<2x128xf32>
    %22 = arith.addf %21, %20 : vector<2x128xf32>
    %23 = arith.divf %21, %22 : vector<2x128xf32>
    %24 = math.tanh %18 : vector<2x128xf32>
    %25 = vector.extract_strided_slice %23 {offsets = [0, 0], sizes = [2, 32], strides = [1, 1]} : vector<2x128xf32> to vector<2x32xf32>
    %26 = vector.extract_strided_slice %23 {offsets = [0, 32], sizes = [2, 32], strides = [1, 1]} : vector<2x128xf32> to vector<2x32xf32>
    %27 = vector.extract_strided_slice %24 {offsets = [0, 64], sizes = [2, 32], strides = [1, 1]} : vector<2x128xf32> to vector<2x32xf32>
    %28 = vector.extract_strided_slice %23 {offsets = [0, 96], sizes = [2, 32], strides = [1, 1]} : vector<2x128xf32> to vector<2x32xf32>
    %29 = arith.mulf %26, %13 : vector<2x32xf32>
    %30 = arith.mulf %25, %27 : vector<2x32xf32>
    %31 = arith.addf %29, %30 : vector<2x32xf32>
    %32 = math.tanh %31 : vector<2x32xf32>
    %33 = arith.mulf %28, %32 : vector<2x32xf32>
    %cst_19 = arith.constant dense<0.000000e+00> : vector<2x128xf32>
    %34 = tpu.matmul %33, %1, %cst_19 {dimension_numbers = #tpu.dot_dimension_numbers<[1], [0], [0], [1], [0, 0, 1, 1], [], []>} : vector<2x32xf32>, vector<32x128xf32>, vector<2x128xf32> -> vector<2x128xf32>
    %35 = vector.broadcast %5 : vector<1x128xf32> to vector<2x128xf32>
    %36 = arith.addf %34, %35 : vector<2x128xf32>
    %cst_20 = arith.constant dense<0.000000e+00> : vector<2x128xf32>
    %37 = tpu.matmul %12, %3, %cst_20 {dimension_numbers = #tpu.dot_dimension_numbers<[1], [0], [0], [1], [0, 0, 1, 1], [], []>} : vector<2x32xf32>, vector<32x128xf32>, vector<2x128xf32> -> vector<2x128xf32>
    %38 = arith.addf %36, %37 : vector<2x128xf32>
    %39 = arith.negf %38 : vector<2x128xf32>
    %40 = math.exp %39 : vector<2x128xf32>
    %cst_21 = arith.constant 1.000000e+00 : f32
    %41 = vector.broadcast %cst_21 : f32 to vector<2x128xf32>
    %42 = arith.addf %41, %40 : vector<2x128xf32>
    %43 = arith.divf %41, %42 : vector<2x128xf32>
    %44 = math.tanh %38 : vector<2x128xf32>
    %45 = vector.extract_strided_slice %43 {offsets = [0, 0], sizes = [2, 32], strides = [1, 1]} : vector<2x128xf32> to vector<2x32xf32>
    %46 = vector.extract_strided_slice %43 {offsets = [0, 32], sizes = [2, 32], strides = [1, 1]} : vector<2x128xf32> to vector<2x32xf32>
    %47 = vector.extract_strided_slice %44 {offsets = [0, 64], sizes = [2, 32], strides = [1, 1]} : vector<2x128xf32> to vector<2x32xf32>
    %48 = vector.extract_strided_slice %43 {offsets = [0, 96], sizes = [2, 32], strides = [1, 1]} : vector<2x128xf32> to vector<2x32xf32>
    %49 = arith.mulf %46, %14 : vector<2x32xf32>
    %50 = arith.mulf %45, %47 : vector<2x32xf32>
    %51 = arith.addf %49, %50 : vector<2x32xf32>
    %52 = math.tanh %51 : vector<2x32xf32>
    %53 = arith.mulf %48, %52 : vector<2x32xf32>
    %54 = vector.extract_strided_slice %10 {offsets = [1, 0, 0], sizes = [1, 2, 128], strides = [1, 1, 1]} : vector<8x2x128xf32> to vector<1x2x128xf32>
    %55 = vector.shape_cast %54 : vector<1x2x128xf32> to vector<2x128xf32>
    %cst_22 = arith.constant dense<0.000000e+00> : vector<2x128xf32>
    %56 = tpu.matmul %33, %2, %cst_22 {dimension_numbers = #tpu.dot_dimension_numbers<[1], [0], [0], [1], [0, 0, 1, 1], [], []>} : vector<2x32xf32>, vector<32x128xf32>, vector<2x128xf32> -> vector<2x128xf32>
    %57 = arith.addf %55, %56 : vector<2x128xf32>
    %58 = arith.negf %57 : vector<2x128xf32>
    %59 = math.exp %58 : vector<2x128xf32>
    %cst_23 = arith.constant 1.000000e+00 : f32
    %60 = vector.broadcast %cst_23 : f32 to vector<2x128xf32>
    %61 = arith.addf %60, %59 : vector<2x128xf32>
    %62 = arith.divf %60, %61 : vector<2x128xf32>
    %63 = math.tanh %57 : vector<2x128xf32>
    %64 = vector.extract_strided_slice %62 {offsets = [0, 0], sizes = [2, 32], strides = [1, 1]} : vector<2x128xf32> to vector<2x32xf32>
    %65 = vector.extract_strided_slice %62 {offsets = [0, 32], sizes = [2, 32], strides = [1, 1]} : vector<2x128xf32> to vector<2x32xf32>
    %66 = vector.extract_strided_slice %63 {offsets = [0, 64], sizes = [2, 32], strides = [1, 1]} : vector<2x128xf32> to vector<2x32xf32>
    %67 = vector.extract_strided_slice %62 {offsets = [0, 96], sizes = [2, 32], strides = [1, 1]} : vector<2x128xf32> to vector<2x32xf32>
    %68 = arith.mulf %65, %31 : vector<2x32xf32>
    %69 = arith.mulf %64, %66 : vector<2x32xf32>
    %70 = arith.addf %68, %69 : vector<2x32xf32>
    %71 = math.tanh %70 : vector<2x32xf32>
    %72 = arith.mulf %67, %71 : vector<2x32xf32>
    %cst_24 = arith.constant dense<0.000000e+00> : vector<2x128xf32>
    %73 = tpu.matmul %72, %1, %cst_24 {dimension_numbers = #tpu.dot_dimension_numbers<[1], [0], [0], [1], [0, 0, 1, 1], [], []>} : vector<2x32xf32>, vector<32x128xf32>, vector<2x128xf32> -> vector<2x128xf32>
    %74 = vector.broadcast %5 : vector<1x128xf32> to vector<2x128xf32>
    %75 = arith.addf %73, %74 : vector<2x128xf32>
    %cst_25 = arith.constant dense<0.000000e+00> : vector<2x128xf32>
    %76 = tpu.matmul %53, %3, %cst_25 {dimension_numbers = #tpu.dot_dimension_numbers<[1], [0], [0], [1], [0, 0, 1, 1], [], []>} : vector<2x32xf32>, vector<32x128xf32>, vector<2x128xf32> -> vector<2x128xf32>
    %77 = arith.addf %75, %76 : vector<2x128xf32>
    %78 = arith.negf %77 : vector<2x128xf32>
    %79 = math.exp %78 : vector<2x128xf32>
    %cst_26 = arith.constant 1.000000e+00 : f32
    %80 = vector.broadcast %cst_26 : f32 to vector<2x128xf32>
    %81 = arith.addf %80, %79 : vector<2x128xf32>
    %82 = arith.divf %80, %81 : vector<2x128xf32>
    %83 = math.tanh %77 : vector<2x128xf32>
    %84 = vector.extract_strided_slice %82 {offsets = [0, 0], sizes = [2, 32], strides = [1, 1]} : vector<2x128xf32> to vector<2x32xf32>
    %85 = vector.extract_strided_slice %82 {offsets = [0, 32], sizes = [2, 32], strides = [1, 1]} : vector<2x128xf32> to vector<2x32xf32>
    %86 = vector.extract_strided_slice %83 {offsets = [0, 64], sizes = [2, 32], strides = [1, 1]} : vector<2x128xf32> to vector<2x32xf32>
    %87 = vector.extract_strided_slice %82 {offsets = [0, 96], sizes = [2, 32], strides = [1, 1]} : vector<2x128xf32> to vector<2x32xf32>
    %88 = arith.mulf %85, %51 : vector<2x32xf32>
    %89 = arith.mulf %84, %86 : vector<2x32xf32>
    %90 = arith.addf %88, %89 : vector<2x32xf32>
    %91 = math.tanh %90 : vector<2x32xf32>
    %92 = arith.mulf %87, %91 : vector<2x32xf32>
    %93 = vector.extract_strided_slice %10 {offsets = [2, 0, 0], sizes = [1, 2, 128], strides = [1, 1, 1]} : vector<8x2x128xf32> to vector<1x2x128xf32>
    %94 = vector.shape_cast %93 : vector<1x2x128xf32> to vector<2x128xf32>
    %cst_27 = arith.constant dense<0.000000e+00> : vector<2x128xf32>
    %95 = tpu.matmul %72, %2, %cst_27 {dimension_numbers = #tpu.dot_dimension_numbers<[1], [0], [0], [1], [0, 0, 1, 1], [], []>} : vector<2x32xf32>, vector<32x128xf32>, vector<2x128xf32> -> vector<2x128xf32>
    %96 = arith.addf %94, %95 : vector<2x128xf32>
    %97 = arith.negf %96 : vector<2x128xf32>
    %98 = math.exp %97 : vector<2x128xf32>
    %cst_28 = arith.constant 1.000000e+00 : f32
    %99 = vector.broadcast %cst_28 : f32 to vector<2x128xf32>
    %100 = arith.addf %99, %98 : vector<2x128xf32>
    %101 = arith.divf %99, %100 : vector<2x128xf32>
    %102 = math.tanh %96 : vector<2x128xf32>
    %103 = vector.extract_strided_slice %101 {offsets = [0, 0], sizes = [2, 32], strides = [1, 1]} : vector<2x128xf32> to vector<2x32xf32>
    %104 = vector.extract_strided_slice %101 {offsets = [0, 32], sizes = [2, 32], strides = [1, 1]} : vector<2x128xf32> to vector<2x32xf32>
    %105 = vector.extract_strided_slice %102 {offsets = [0, 64], sizes = [2, 32], strides = [1, 1]} : vector<2x128xf32> to vector<2x32xf32>
    %106 = vector.extract_strided_slice %101 {offsets = [0, 96], sizes = [2, 32], strides = [1, 1]} : vector<2x128xf32> to vector<2x32xf32>
    %107 = arith.mulf %104, %70 : vector<2x32xf32>
    %108 = arith.mulf %103, %105 : vector<2x32xf32>
    %109 = arith.addf %107, %108 : vector<2x32xf32>
    %110 = math.tanh %109 : vector<2x32xf32>
    %111 = arith.mulf %106, %110 : vector<2x32xf32>
    %cst_29 = arith.constant dense<0.000000e+00> : vector<2x128xf32>
    %112 = tpu.matmul %111, %1, %cst_29 {dimension_numbers = #tpu.dot_dimension_numbers<[1], [0], [0], [1], [0, 0, 1, 1], [], []>} : vector<2x32xf32>, vector<32x128xf32>, vector<2x128xf32> -> vector<2x128xf32>
    %113 = vector.broadcast %5 : vector<1x128xf32> to vector<2x128xf32>
    %114 = arith.addf %112, %113 : vector<2x128xf32>
    %cst_30 = arith.constant dense<0.000000e+00> : vector<2x128xf32>
    %115 = tpu.matmul %92, %3, %cst_30 {dimension_numbers = #tpu.dot_dimension_numbers<[1], [0], [0], [1], [0, 0, 1, 1], [], []>} : vector<2x32xf32>, vector<32x128xf32>, vector<2x128xf32> -> vector<2x128xf32>
    %116 = arith.addf %114, %115 : vector<2x128xf32>
    %117 = arith.negf %116 : vector<2x128xf32>
    %118 = math.exp %117 : vector<2x128xf32>
    %cst_31 = arith.constant 1.000000e+00 : f32
    %119 = vector.broadcast %cst_31 : f32 to vector<2x128xf32>
    %120 = arith.addf %119, %118 : vector<2x128xf32>
    %121 = arith.divf %119, %120 : vector<2x128xf32>
    %122 = math.tanh %116 : vector<2x128xf32>
    %123 = vector.extract_strided_slice %121 {offsets = [0, 0], sizes = [2, 32], strides = [1, 1]} : vector<2x128xf32> to vector<2x32xf32>
    %124 = vector.extract_strided_slice %121 {offsets = [0, 32], sizes = [2, 32], strides = [1, 1]} : vector<2x128xf32> to vector<2x32xf32>
    %125 = vector.extract_strided_slice %122 {offsets = [0, 64], sizes = [2, 32], strides = [1, 1]} : vector<2x128xf32> to vector<2x32xf32>
    %126 = vector.extract_strided_slice %121 {offsets = [0, 96], sizes = [2, 32], strides = [1, 1]} : vector<2x128xf32> to vector<2x32xf32>
    %127 = arith.mulf %124, %90 : vector<2x32xf32>
    %128 = arith.mulf %123, %125 : vector<2x32xf32>
    %129 = arith.addf %127, %128 : vector<2x32xf32>
    %130 = math.tanh %129 : vector<2x32xf32>
    %131 = arith.mulf %126, %130 : vector<2x32xf32>
    %132 = vector.extract_strided_slice %10 {offsets = [3, 0, 0], sizes = [1, 2, 128], strides = [1, 1, 1]} : vector<8x2x128xf32> to vector<1x2x128xf32>
    %133 = vector.shape_cast %132 : vector<1x2x128xf32> to vector<2x128xf32>
    %cst_32 = arith.constant dense<0.000000e+00> : vector<2x128xf32>
    %134 = tpu.matmul %111, %2, %cst_32 {dimension_numbers = #tpu.dot_dimension_numbers<[1], [0], [0], [1], [0, 0, 1, 1], [], []>} : vector<2x32xf32>, vector<32x128xf32>, vector<2x128xf32> -> vector<2x128xf32>
    %135 = arith.addf %133, %134 : vector<2x128xf32>
    %136 = arith.negf %135 : vector<2x128xf32>
    %137 = math.exp %136 : vector<2x128xf32>
    %cst_33 = arith.constant 1.000000e+00 : f32
    %138 = vector.broadcast %cst_33 : f32 to vector<2x128xf32>
    %139 = arith.addf %138, %137 : vector<2x128xf32>
    %140 = arith.divf %138, %139 : vector<2x128xf32>
    %141 = math.tanh %135 : vector<2x128xf32>
    %142 = vector.extract_strided_slice %140 {offsets = [0, 0], sizes = [2, 32], strides = [1, 1]} : vector<2x128xf32> to vector<2x32xf32>
    %143 = vector.extract_strided_slice %140 {offsets = [0, 32], sizes = [2, 32], strides = [1, 1]} : vector<2x128xf32> to vector<2x32xf32>
    %144 = vector.extract_strided_slice %141 {offsets = [0, 64], sizes = [2, 32], strides = [1, 1]} : vector<2x128xf32> to vector<2x32xf32>
    %145 = vector.extract_strided_slice %140 {offsets = [0, 96], sizes = [2, 32], strides = [1, 1]} : vector<2x128xf32> to vector<2x32xf32>
    %146 = arith.mulf %143, %109 : vector<2x32xf32>
    %147 = arith.mulf %142, %144 : vector<2x32xf32>
    %148 = arith.addf %146, %147 : vector<2x32xf32>
    %149 = math.tanh %148 : vector<2x32xf32>
    %150 = arith.mulf %145, %149 : vector<2x32xf32>
    %cst_34 = arith.constant dense<0.000000e+00> : vector<2x128xf32>
    %151 = tpu.matmul %150, %1, %cst_34 {dimension_numbers = #tpu.dot_dimension_numbers<[1], [0], [0], [1], [0, 0, 1, 1], [], []>} : vector<2x32xf32>, vector<32x128xf32>, vector<2x128xf32> -> vector<2x128xf32>
    %152 = vector.broadcast %5 : vector<1x128xf32> to vector<2x128xf32>
    %153 = arith.addf %151, %152 : vector<2x128xf32>
    %cst_35 = arith.constant dense<0.000000e+00> : vector<2x128xf32>
    %154 = tpu.matmul %131, %3, %cst_35 {dimension_numbers = #tpu.dot_dimension_numbers<[1], [0], [0], [1], [0, 0, 1, 1], [], []>} : vector<2x32xf32>, vector<32x128xf32>, vector<2x128xf32> -> vector<2x128xf32>
    %155 = arith.addf %153, %154 : vector<2x128xf32>
    %156 = arith.negf %155 : vector<2x128xf32>
    %157 = math.exp %156 : vector<2x128xf32>
    %cst_36 = arith.constant 1.000000e+00 : f32
    %158 = vector.broadcast %cst_36 : f32 to vector<2x128xf32>
    %159 = arith.addf %158, %157 : vector<2x128xf32>
    %160 = arith.divf %158, %159 : vector<2x128xf32>
    %161 = math.tanh %155 : vector<2x128xf32>
    %162 = vector.extract_strided_slice %160 {offsets = [0, 0], sizes = [2, 32], strides = [1, 1]} : vector<2x128xf32> to vector<2x32xf32>
    %163 = vector.extract_strided_slice %160 {offsets = [0, 32], sizes = [2, 32], strides = [1, 1]} : vector<2x128xf32> to vector<2x32xf32>
    %164 = vector.extract_strided_slice %161 {offsets = [0, 64], sizes = [2, 32], strides = [1, 1]} : vector<2x128xf32> to vector<2x32xf32>
    %165 = vector.extract_strided_slice %160 {offsets = [0, 96], sizes = [2, 32], strides = [1, 1]} : vector<2x128xf32> to vector<2x32xf32>
    %166 = arith.mulf %163, %129 : vector<2x32xf32>
    %167 = arith.mulf %162, %164 : vector<2x32xf32>
    %168 = arith.addf %166, %167 : vector<2x32xf32>
    %169 = math.tanh %168 : vector<2x32xf32>
    %170 = arith.mulf %165, %169 : vector<2x32xf32>
    %171 = vector.extract_strided_slice %10 {offsets = [4, 0, 0], sizes = [1, 2, 128], strides = [1, 1, 1]} : vector<8x2x128xf32> to vector<1x2x128xf32>
    %172 = vector.shape_cast %171 : vector<1x2x128xf32> to vector<2x128xf32>
    %cst_37 = arith.constant dense<0.000000e+00> : vector<2x128xf32>
    %173 = tpu.matmul %150, %2, %cst_37 {dimension_numbers = #tpu.dot_dimension_numbers<[1], [0], [0], [1], [0, 0, 1, 1], [], []>} : vector<2x32xf32>, vector<32x128xf32>, vector<2x128xf32> -> vector<2x128xf32>
    %174 = arith.addf %172, %173 : vector<2x128xf32>
    %175 = arith.negf %174 : vector<2x128xf32>
    %176 = math.exp %175 : vector<2x128xf32>
    %cst_38 = arith.constant 1.000000e+00 : f32
    %177 = vector.broadcast %cst_38 : f32 to vector<2x128xf32>
    %178 = arith.addf %177, %176 : vector<2x128xf32>
    %179 = arith.divf %177, %178 : vector<2x128xf32>
    %180 = math.tanh %174 : vector<2x128xf32>
    %181 = vector.extract_strided_slice %179 {offsets = [0, 0], sizes = [2, 32], strides = [1, 1]} : vector<2x128xf32> to vector<2x32xf32>
    %182 = vector.extract_strided_slice %179 {offsets = [0, 32], sizes = [2, 32], strides = [1, 1]} : vector<2x128xf32> to vector<2x32xf32>
    %183 = vector.extract_strided_slice %180 {offsets = [0, 64], sizes = [2, 32], strides = [1, 1]} : vector<2x128xf32> to vector<2x32xf32>
    %184 = vector.extract_strided_slice %179 {offsets = [0, 96], sizes = [2, 32], strides = [1, 1]} : vector<2x128xf32> to vector<2x32xf32>
    %185 = arith.mulf %182, %148 : vector<2x32xf32>
    %186 = arith.mulf %181, %183 : vector<2x32xf32>
    %187 = arith.addf %185, %186 : vector<2x32xf32>
    %188 = math.tanh %187 : vector<2x32xf32>
    %189 = arith.mulf %184, %188 : vector<2x32xf32>
    %cst_39 = arith.constant dense<0.000000e+00> : vector<2x128xf32>
    %190 = tpu.matmul %189, %1, %cst_39 {dimension_numbers = #tpu.dot_dimension_numbers<[1], [0], [0], [1], [0, 0, 1, 1], [], []>} : vector<2x32xf32>, vector<32x128xf32>, vector<2x128xf32> -> vector<2x128xf32>
    %191 = vector.broadcast %5 : vector<1x128xf32> to vector<2x128xf32>
    %192 = arith.addf %190, %191 : vector<2x128xf32>
    %cst_40 = arith.constant dense<0.000000e+00> : vector<2x128xf32>
    %193 = tpu.matmul %170, %3, %cst_40 {dimension_numbers = #tpu.dot_dimension_numbers<[1], [0], [0], [1], [0, 0, 1, 1], [], []>} : vector<2x32xf32>, vector<32x128xf32>, vector<2x128xf32> -> vector<2x128xf32>
    %194 = arith.addf %192, %193 : vector<2x128xf32>
    %195 = arith.negf %194 : vector<2x128xf32>
    %196 = math.exp %195 : vector<2x128xf32>
    %cst_41 = arith.constant 1.000000e+00 : f32
    %197 = vector.broadcast %cst_41 : f32 to vector<2x128xf32>
    %198 = arith.addf %197, %196 : vector<2x128xf32>
    %199 = arith.divf %197, %198 : vector<2x128xf32>
    %200 = math.tanh %194 : vector<2x128xf32>
    %201 = vector.extract_strided_slice %199 {offsets = [0, 0], sizes = [2, 32], strides = [1, 1]} : vector<2x128xf32> to vector<2x32xf32>
    %202 = vector.extract_strided_slice %199 {offsets = [0, 32], sizes = [2, 32], strides = [1, 1]} : vector<2x128xf32> to vector<2x32xf32>
    %203 = vector.extract_strided_slice %200 {offsets = [0, 64], sizes = [2, 32], strides = [1, 1]} : vector<2x128xf32> to vector<2x32xf32>
    %204 = vector.extract_strided_slice %199 {offsets = [0, 96], sizes = [2, 32], strides = [1, 1]} : vector<2x128xf32> to vector<2x32xf32>
    %205 = arith.mulf %202, %168 : vector<2x32xf32>
    %206 = arith.mulf %201, %203 : vector<2x32xf32>
    %207 = arith.addf %205, %206 : vector<2x32xf32>
    %208 = math.tanh %207 : vector<2x32xf32>
    %209 = arith.mulf %204, %208 : vector<2x32xf32>
    %210 = vector.extract_strided_slice %10 {offsets = [5, 0, 0], sizes = [1, 2, 128], strides = [1, 1, 1]} : vector<8x2x128xf32> to vector<1x2x128xf32>
    %211 = vector.shape_cast %210 : vector<1x2x128xf32> to vector<2x128xf32>
    %cst_42 = arith.constant dense<0.000000e+00> : vector<2x128xf32>
    %212 = tpu.matmul %189, %2, %cst_42 {dimension_numbers = #tpu.dot_dimension_numbers<[1], [0], [0], [1], [0, 0, 1, 1], [], []>} : vector<2x32xf32>, vector<32x128xf32>, vector<2x128xf32> -> vector<2x128xf32>
    %213 = arith.addf %211, %212 : vector<2x128xf32>
    %214 = arith.negf %213 : vector<2x128xf32>
    %215 = math.exp %214 : vector<2x128xf32>
    %cst_43 = arith.constant 1.000000e+00 : f32
    %216 = vector.broadcast %cst_43 : f32 to vector<2x128xf32>
    %217 = arith.addf %216, %215 : vector<2x128xf32>
    %218 = arith.divf %216, %217 : vector<2x128xf32>
    %219 = math.tanh %213 : vector<2x128xf32>
    %220 = vector.extract_strided_slice %218 {offsets = [0, 0], sizes = [2, 32], strides = [1, 1]} : vector<2x128xf32> to vector<2x32xf32>
    %221 = vector.extract_strided_slice %218 {offsets = [0, 32], sizes = [2, 32], strides = [1, 1]} : vector<2x128xf32> to vector<2x32xf32>
    %222 = vector.extract_strided_slice %219 {offsets = [0, 64], sizes = [2, 32], strides = [1, 1]} : vector<2x128xf32> to vector<2x32xf32>
    %223 = vector.extract_strided_slice %218 {offsets = [0, 96], sizes = [2, 32], strides = [1, 1]} : vector<2x128xf32> to vector<2x32xf32>
    %224 = arith.mulf %221, %187 : vector<2x32xf32>
    %225 = arith.mulf %220, %222 : vector<2x32xf32>
    %226 = arith.addf %224, %225 : vector<2x32xf32>
    %227 = math.tanh %226 : vector<2x32xf32>
    %228 = arith.mulf %223, %227 : vector<2x32xf32>
    %cst_44 = arith.constant dense<0.000000e+00> : vector<2x128xf32>
    %229 = tpu.matmul %228, %1, %cst_44 {dimension_numbers = #tpu.dot_dimension_numbers<[1], [0], [0], [1], [0, 0, 1, 1], [], []>} : vector<2x32xf32>, vector<32x128xf32>, vector<2x128xf32> -> vector<2x128xf32>
    %230 = vector.broadcast %5 : vector<1x128xf32> to vector<2x128xf32>
    %231 = arith.addf %229, %230 : vector<2x128xf32>
    %cst_45 = arith.constant dense<0.000000e+00> : vector<2x128xf32>
    %232 = tpu.matmul %209, %3, %cst_45 {dimension_numbers = #tpu.dot_dimension_numbers<[1], [0], [0], [1], [0, 0, 1, 1], [], []>} : vector<2x32xf32>, vector<32x128xf32>, vector<2x128xf32> -> vector<2x128xf32>
    %233 = arith.addf %231, %232 : vector<2x128xf32>
    %234 = arith.negf %233 : vector<2x128xf32>
    %235 = math.exp %234 : vector<2x128xf32>
    %cst_46 = arith.constant 1.000000e+00 : f32
    %236 = vector.broadcast %cst_46 : f32 to vector<2x128xf32>
    %237 = arith.addf %236, %235 : vector<2x128xf32>
    %238 = arith.divf %236, %237 : vector<2x128xf32>
    %239 = math.tanh %233 : vector<2x128xf32>
    %240 = vector.extract_strided_slice %238 {offsets = [0, 0], sizes = [2, 32], strides = [1, 1]} : vector<2x128xf32> to vector<2x32xf32>
    %241 = vector.extract_strided_slice %238 {offsets = [0, 32], sizes = [2, 32], strides = [1, 1]} : vector<2x128xf32> to vector<2x32xf32>
    %242 = vector.extract_strided_slice %239 {offsets = [0, 64], sizes = [2, 32], strides = [1, 1]} : vector<2x128xf32> to vector<2x32xf32>
    %243 = vector.extract_strided_slice %238 {offsets = [0, 96], sizes = [2, 32], strides = [1, 1]} : vector<2x128xf32> to vector<2x32xf32>
    %244 = arith.mulf %241, %207 : vector<2x32xf32>
    %245 = arith.mulf %240, %242 : vector<2x32xf32>
    %246 = arith.addf %244, %245 : vector<2x32xf32>
    %247 = math.tanh %246 : vector<2x32xf32>
    %248 = arith.mulf %243, %247 : vector<2x32xf32>
    %249 = vector.extract_strided_slice %10 {offsets = [6, 0, 0], sizes = [1, 2, 128], strides = [1, 1, 1]} : vector<8x2x128xf32> to vector<1x2x128xf32>
    %250 = vector.shape_cast %249 : vector<1x2x128xf32> to vector<2x128xf32>
    %cst_47 = arith.constant dense<0.000000e+00> : vector<2x128xf32>
    %251 = tpu.matmul %228, %2, %cst_47 {dimension_numbers = #tpu.dot_dimension_numbers<[1], [0], [0], [1], [0, 0, 1, 1], [], []>} : vector<2x32xf32>, vector<32x128xf32>, vector<2x128xf32> -> vector<2x128xf32>
    %252 = arith.addf %250, %251 : vector<2x128xf32>
    %253 = arith.negf %252 : vector<2x128xf32>
    %254 = math.exp %253 : vector<2x128xf32>
    %cst_48 = arith.constant 1.000000e+00 : f32
    %255 = vector.broadcast %cst_48 : f32 to vector<2x128xf32>
    %256 = arith.addf %255, %254 : vector<2x128xf32>
    %257 = arith.divf %255, %256 : vector<2x128xf32>
    %258 = math.tanh %252 : vector<2x128xf32>
    %259 = vector.extract_strided_slice %257 {offsets = [0, 0], sizes = [2, 32], strides = [1, 1]} : vector<2x128xf32> to vector<2x32xf32>
    %260 = vector.extract_strided_slice %257 {offsets = [0, 32], sizes = [2, 32], strides = [1, 1]} : vector<2x128xf32> to vector<2x32xf32>
    %261 = vector.extract_strided_slice %258 {offsets = [0, 64], sizes = [2, 32], strides = [1, 1]} : vector<2x128xf32> to vector<2x32xf32>
    %262 = vector.extract_strided_slice %257 {offsets = [0, 96], sizes = [2, 32], strides = [1, 1]} : vector<2x128xf32> to vector<2x32xf32>
    %263 = arith.mulf %260, %226 : vector<2x32xf32>
    %264 = arith.mulf %259, %261 : vector<2x32xf32>
    %265 = arith.addf %263, %264 : vector<2x32xf32>
    %266 = math.tanh %265 : vector<2x32xf32>
    %267 = arith.mulf %262, %266 : vector<2x32xf32>
    %cst_49 = arith.constant dense<0.000000e+00> : vector<2x128xf32>
    %268 = tpu.matmul %267, %1, %cst_49 {dimension_numbers = #tpu.dot_dimension_numbers<[1], [0], [0], [1], [0, 0, 1, 1], [], []>} : vector<2x32xf32>, vector<32x128xf32>, vector<2x128xf32> -> vector<2x128xf32>
    %269 = vector.broadcast %5 : vector<1x128xf32> to vector<2x128xf32>
    %270 = arith.addf %268, %269 : vector<2x128xf32>
    %cst_50 = arith.constant dense<0.000000e+00> : vector<2x128xf32>
    %271 = tpu.matmul %248, %3, %cst_50 {dimension_numbers = #tpu.dot_dimension_numbers<[1], [0], [0], [1], [0, 0, 1, 1], [], []>} : vector<2x32xf32>, vector<32x128xf32>, vector<2x128xf32> -> vector<2x128xf32>
    %272 = arith.addf %270, %271 : vector<2x128xf32>
    %273 = arith.negf %272 : vector<2x128xf32>
    %274 = math.exp %273 : vector<2x128xf32>
    %cst_51 = arith.constant 1.000000e+00 : f32
    %275 = vector.broadcast %cst_51 : f32 to vector<2x128xf32>
    %276 = arith.addf %275, %274 : vector<2x128xf32>
    %277 = arith.divf %275, %276 : vector<2x128xf32>
    %278 = math.tanh %272 : vector<2x128xf32>
    %279 = vector.extract_strided_slice %277 {offsets = [0, 0], sizes = [2, 32], strides = [1, 1]} : vector<2x128xf32> to vector<2x32xf32>
    %280 = vector.extract_strided_slice %277 {offsets = [0, 32], sizes = [2, 32], strides = [1, 1]} : vector<2x128xf32> to vector<2x32xf32>
    %281 = vector.extract_strided_slice %278 {offsets = [0, 64], sizes = [2, 32], strides = [1, 1]} : vector<2x128xf32> to vector<2x32xf32>
    %282 = vector.extract_strided_slice %277 {offsets = [0, 96], sizes = [2, 32], strides = [1, 1]} : vector<2x128xf32> to vector<2x32xf32>
    %283 = arith.mulf %280, %246 : vector<2x32xf32>
    %284 = arith.mulf %279, %281 : vector<2x32xf32>
    %285 = arith.addf %283, %284 : vector<2x32xf32>
    %286 = math.tanh %285 : vector<2x32xf32>
    %287 = arith.mulf %282, %286 : vector<2x32xf32>
    %288 = vector.extract_strided_slice %10 {offsets = [7, 0, 0], sizes = [1, 2, 128], strides = [1, 1, 1]} : vector<8x2x128xf32> to vector<1x2x128xf32>
    %289 = vector.shape_cast %288 : vector<1x2x128xf32> to vector<2x128xf32>
    %cst_52 = arith.constant dense<0.000000e+00> : vector<2x128xf32>
    %290 = tpu.matmul %267, %2, %cst_52 {dimension_numbers = #tpu.dot_dimension_numbers<[1], [0], [0], [1], [0, 0, 1, 1], [], []>} : vector<2x32xf32>, vector<32x128xf32>, vector<2x128xf32> -> vector<2x128xf32>
    %291 = arith.addf %289, %290 : vector<2x128xf32>
    %292 = arith.negf %291 : vector<2x128xf32>
    %293 = math.exp %292 : vector<2x128xf32>
    %cst_53 = arith.constant 1.000000e+00 : f32
    %294 = vector.broadcast %cst_53 : f32 to vector<2x128xf32>
    %295 = arith.addf %294, %293 : vector<2x128xf32>
    %296 = arith.divf %294, %295 : vector<2x128xf32>
    %297 = math.tanh %291 : vector<2x128xf32>
    %298 = vector.extract_strided_slice %296 {offsets = [0, 0], sizes = [2, 32], strides = [1, 1]} : vector<2x128xf32> to vector<2x32xf32>
    %299 = vector.extract_strided_slice %296 {offsets = [0, 32], sizes = [2, 32], strides = [1, 1]} : vector<2x128xf32> to vector<2x32xf32>
    %300 = vector.extract_strided_slice %297 {offsets = [0, 64], sizes = [2, 32], strides = [1, 1]} : vector<2x128xf32> to vector<2x32xf32>
    %301 = vector.extract_strided_slice %296 {offsets = [0, 96], sizes = [2, 32], strides = [1, 1]} : vector<2x128xf32> to vector<2x32xf32>
    %302 = arith.mulf %299, %265 : vector<2x32xf32>
    %303 = arith.mulf %298, %300 : vector<2x32xf32>
    %304 = arith.addf %302, %303 : vector<2x32xf32>
    %305 = math.tanh %304 : vector<2x32xf32>
    %306 = arith.mulf %301, %305 : vector<2x32xf32>
    %cst_54 = arith.constant dense<0.000000e+00> : vector<2x128xf32>
    %307 = tpu.matmul %306, %1, %cst_54 {dimension_numbers = #tpu.dot_dimension_numbers<[1], [0], [0], [1], [0, 0, 1, 1], [], []>} : vector<2x32xf32>, vector<32x128xf32>, vector<2x128xf32> -> vector<2x128xf32>
    %308 = vector.broadcast %5 : vector<1x128xf32> to vector<2x128xf32>
    %309 = arith.addf %307, %308 : vector<2x128xf32>
    %cst_55 = arith.constant dense<0.000000e+00> : vector<2x128xf32>
    %310 = tpu.matmul %287, %3, %cst_55 {dimension_numbers = #tpu.dot_dimension_numbers<[1], [0], [0], [1], [0, 0, 1, 1], [], []>} : vector<2x32xf32>, vector<32x128xf32>, vector<2x128xf32> -> vector<2x128xf32>
    %311 = arith.addf %309, %310 : vector<2x128xf32>
    %312 = arith.negf %311 : vector<2x128xf32>
    %313 = math.exp %312 : vector<2x128xf32>
    %cst_56 = arith.constant 1.000000e+00 : f32
    %314 = vector.broadcast %cst_56 : f32 to vector<2x128xf32>
    %315 = arith.addf %314, %313 : vector<2x128xf32>
    %316 = arith.divf %314, %315 : vector<2x128xf32>
    %317 = math.tanh %311 : vector<2x128xf32>
    %318 = vector.extract_strided_slice %316 {offsets = [0, 0], sizes = [2, 32], strides = [1, 1]} : vector<2x128xf32> to vector<2x32xf32>
    %319 = vector.extract_strided_slice %316 {offsets = [0, 32], sizes = [2, 32], strides = [1, 1]} : vector<2x128xf32> to vector<2x32xf32>
    %320 = vector.extract_strided_slice %317 {offsets = [0, 64], sizes = [2, 32], strides = [1, 1]} : vector<2x128xf32> to vector<2x32xf32>
    %321 = vector.extract_strided_slice %316 {offsets = [0, 96], sizes = [2, 32], strides = [1, 1]} : vector<2x128xf32> to vector<2x32xf32>
    %322 = arith.mulf %319, %285 : vector<2x32xf32>
    %323 = arith.mulf %318, %320 : vector<2x32xf32>
    %324 = arith.addf %322, %323 : vector<2x32xf32>
    %325 = math.tanh %324 : vector<2x32xf32>
    %326 = arith.mulf %321, %325 : vector<2x32xf32>
    %c0_57 = arith.constant 0 : index
    %c0_58 = arith.constant 0 : index
    %327 = vector.load %arg7[%c0_57, %c0_58] : memref<32x20xf32, #tpu.memory_space<vmem>>, vector<32x20xf32>
    %cst_59 = arith.constant dense<0.000000e+00> : vector<2x20xf32>
    %328 = tpu.matmul %326, %327, %cst_59 {dimension_numbers = #tpu.dot_dimension_numbers<[1], [0], [0], [1], [0, 0, 1, 1], [], []>} : vector<2x32xf32>, vector<32x20xf32>, vector<2x20xf32> -> vector<2x20xf32>
    %c0_60 = arith.constant 0 : index
    %c0_61 = arith.constant 0 : index
    %329 = vector.load %arg8[%c0_60, %c0_61] : memref<1x20xf32, #tpu.memory_space<vmem>>, vector<1x20xf32>
    %330 = vector.broadcast %329 : vector<1x20xf32> to vector<2x20xf32>
    %331 = arith.addf %328, %330 : vector<2x20xf32>
    %c0_62 = arith.constant 0 : index
    %c0_63 = arith.constant 0 : index
    %332 = vector.load %arg9[%c0_62, %c0_63] : memref<2x20xf32, #tpu.memory_space<vmem>>, vector<2x20xf32>
    tpu.vector_store %arg9[%c0_62, %c0_63], %331 {strides = array<i32>} : memref<2x20xf32, #tpu.memory_space<vmem>>, vector<2x20xf32>,
    return
  }
}

</mosaic_0001>

<bundles_post_ra>
// kernel: tpu_custom_call.1
= control target key start
LH: loop header
LB: loop body
LE: loop exit
PB: predicated region body
PF: predicated region fallthrough
CT: control target
= control target key end

     0   :  { %14 = vsyncpa [#allocation3], 0  ;;  %s3847_s0 = inlined_call_operand.hbm [shape: f32[16,32], index: 0, kind: input, shape index: {}]   ;;  %s3848_s1 = inlined_call_operand.vmem [shape: f32[32,128], index: 1, kind: input, shape index: {}]   ;;  %s3849_s2 = inlined_call_operand.hbm [shape: f32[32,128], index: 2, kind: input, shape index: {}]   ;;  %s3850_s3 = inlined_call_operand.vmem [shape: f32[1,128], index: 3, kind: input, shape index: {}]   ;;  %s3851_s4 = inlined_call_operand.hbm [shape: f32[32,128], index: 4, kind: input, shape index: {}]   ;;  %s3852_s5 = inlined_call_operand.vmem [shape: f32[32,128], index: 5, kind: input, shape index: {}]   ;;  %s3853_s6 = inlined_call_operand.vmem [shape: f32[1,128], index: 6, kind: input, shape index: {}]   ;;  %s3854_s7 = inlined_call_operand.vmem [shape: f32[32,20], index: 7, kind: input, shape index: {}]   ;;  %s3855_s8 = inlined_call_operand.vmem [shape: f32[1,20], index: 8, kind: input, shape index: {}]   ;;  %s3856_s9 = inlined_call_operand.hbm [shape: f32[2,20], index: 9, kind: output, shape index: {}]  }
   0x1   :  { %15 = vsyncpa [#allocation6], 0 }
   0x2   :  { %16 = vsyncpa [#allocation4], 0  ;;  %s3249_s30 = smov [#allocation5]   ;;  %s3250_s11 = smov [#allocation2]  }
   0x3   :  { %s36_s10 = sshll.u32 %s3249_s30, 4  ;;  %s22_s12 = sshll.u32 %s3250_s11, 4  ;;  %s37_s10 = int_to_ptr.vmem [resolvable:$true] %s36_s10  ;;  %s23_s12 = int_to_ptr.vmem [resolvable:$true] %s22_s12 }
   0x4   :  { %s3171_s13 = scalar_lea.vmem %s37_s10, 512  ;;  %p3176_p1 = scmp.lt.s32.totalorder %s37_s10, %s37_s10 }
   0x5   :  { %p3172_p0 = scmp.ne.s32.totalorder %s37_s10, %s3171_s13  ;;  %p3177_p2 = scmp.lt.s32.totalorder %s3171_s13, %s3171_s13 }
   0x7   :  { %p3178_p3 = por %p3177_p2, %p3176_p1 }
   0x9   :  { %p3179_p4 = pnand %p3178_p3, %p3172_p0 }
   0xb   :  { %3182 = shalt.err (!%p3179_p4)
}
   0xc   :  { %s3251_s14 = smov 128   ;;  %s3252_s15 = smov 8  }
   0xd   :  { %42 = dma.hbm_to_vmem [thread:$0]  %s3849_s2, 512, %s37_s10, [#allocation6], %s3251_s14, %s3251_s14, %s3252_s15  }
   0xe   :  { %s3191_s18 = scalar_lea.vmem %s23_s12, 256  ;;  %p3196_p6 = scmp.lt.s32.totalorder %s23_s12, %s23_s12 }
   0xf   :  { %p3192_p5 = scmp.ne.s32.totalorder %s23_s12, %s3191_s18  ;;  %p3197_p7 = scmp.lt.s32.totalorder %s3191_s18, %s3191_s18 }
  0x11   :  { %p3198_p8 = por %p3197_p7, %p3196_p6 }
  0x13   :  { %p3199_p9 = pnand %p3198_p8, %p3192_p5 }
  0x15   :  { %3202 = shalt.err (!%p3199_p9)
}
  0x16   :  { %28 = dma.hbm_to_vmem [thread:$0]  %s3847_s0, 256, %s23_s12, [#allocation3], %s3251_s14, %s3251_s14, %s3252_s15  }
  0x17   :  { %s3253_s21 = smov [#allocation7]  }
  0x18   :  { %s50_s22 = sshll.u32 %s3253_s21, 4  ;;  %s51_s22 = int_to_ptr.vmem [resolvable:$true] %s50_s22 }
  0x19   :  { %s3211_s23 = scalar_lea.vmem %s51_s22, 512  ;;  %p3216_p11 = scmp.lt.s32.totalorder %s51_s22, %s51_s22 }
  0x1a   :  { %p3212_p10 = scmp.ne.s32.totalorder %s51_s22, %s3211_s23  ;;  %p3217_p12 = scmp.lt.s32.totalorder %s3211_s23, %s3211_s23 }
  0x1c   :  { %p3218_p13 = por %p3217_p12, %p3216_p11 }
  0x1e   :  { %p3219_p0 = pnand %p3218_p13, %p3212_p10 }
  0x20   :  { %3222 = shalt.err (!%p3219_p0)
}
  0x21   :  { %56 = dma.hbm_to_vmem [thread:$0]  %s3851_s4, 512, %s51_s22, [#allocation6], %s3251_s14, %s3251_s14, %s3252_s15  }
  0x22   :  { %3243 = dma.done.wait [#allocation3], 256  }
  0x23   :  { %3244 = vsyncadd [#allocation3], 4294967040 }
  0x24   :  { %3245 = dma.done.wait [#allocation6], 1024  }
  0x25   :  { %3246 = vsyncadd [#allocation6], 4294966272  ;;  %v3254_v0 = vmov 0.0   ;;  %vm3255_vm0 = vmmov 0   ;;  %v77_v1 = vld [vmem:[%s3848_s1 + $0x18] sm:$0xff]  ;;  %v76_v2 = vld [vmem:[%s3848_s1 + $0x10] sm:$0xff]  ;;  %v188_v13 = vlaneseq }
  0x26   :  { %2736 = vmatprep.subr.mxu1 %v3254_v0  ;;  %2744 = vmatprep.mubr.msk.f32.mxu1 %vm3255_vm0, %v3254_v0  ;;  %v3328_v3 = vld [vmem:[#allocation5 + $0x18] sm:$0xff]  ;;  %v92_v4 = vld [vmem:[#allocation2] sm:$0xff]  ;;  %vm100_vm1 = vcmask 261120   ;;  %v3341_v8 = vld [vmem:[#allocation5 + $0x8] sm:$0xff]  ;;  %v3256_v11 = vmov 1983009808  }
  0x27   :  { %2725 = vmatprep.subr.mxu0 %v77_v1  ;;  %v75_v5 = vld [vmem:[%s3848_s1 + $0x8] sm:$0xff]  ;;  %2737 = vmatpush3.msra.mxu1 %v3328_v3  ;;  %v3334_v6 = vld [vmem:[#allocation5 + $0x10] sm:$0xff]  ;;  %v3345_v10 = vld [vmem:[#allocation5] sm:$0xff]  ;;  %v186_v12 = vunpack.c.l.s4 %v3256_v11  ;;  %v189_v16 = vshrl.u32 %v188_v13, 7  ;;  %s3258_s11 = smov 32   ;;  %s3259_s16 = smov [#allocation8]  }
  0x28   :  { %2726 = vmatpush3.msra.mxu0 %v77_v1  ;;  %2738 = vmatprep.subr.mxu1 %v3254_v0  ;;  %v74_v7 = vld [vmem:[%s3848_s1] sm:$0xff]  ;;  %v93_v9 = vld [vmem:[#allocation2 + $0x8] sm:$0xff]  ;;  %v3384_v38 = vld [vmem:[%s3852_s5 + $0x18] sm:$0xff]  ;;  %vm2532_vm2 = vcmask 156672  }
  0x29   :  { %2727 = vmatprep.subr.mxu0 %v76_v2  ;;  %2733 = vmatprep.mubr.msk.f32.mxu0 %vm100_vm1, %v92_v4  ;;  %v2550_v14 = vld [vmem:[%s3850_s3] ss:$0 sm:$0xff]  ;;  %v187_v15 = vunpack.c.0.s8 %v186_v12  ;;  %s3257_s3 = smov 64   ;;  %v3377_v36 = vld [vmem:[#allocation7 + $0x18] sm:$0xff]  ;;  %v3391_v39 = vld [vmem:[%s3852_s5 + $0x10] sm:$0xff] }
  0x2a   :  { %2728 = vmatpush3.msra.mxu0 %v76_v2  ;;  %2739 = vmatpush3.msra.mxu1 %v3334_v6  ;;  %v3379_v37 = vld [vmem:[#allocation7 + $0x10] sm:$0xff]  ;;  %v3394_v40 = vld [vmem:[#allocation7 + $0x8] sm:$0xff]  ;;  %v3400_v41 = vld [vmem:[%s3852_s5 + $0x8] sm:$0xff] }
  0x2b   :  { %2729 = vmatprep.subr.mxu0 %v75_v5  ;;  %2740 = vmatprep.subr.mxu1 %v3254_v0  ;;  %v3365_v22 = vsub.s32 %v187_v15, %v189_v16  ;;  %v3405_v42 = vld [vmem:[#allocation7] sm:$0xff]  ;;  %v3418_v44 = vld [vmem:[%s3852_s5] sm:$0xff] }
  0x2c   :  { %2730 = vmatpush3.msra.mxu0 %v75_v5  ;;  %2741 = vmatpush3.msra.mxu1 %v3341_v8  ;;  %v3460_v51 = vld [vmem:[%s3853_s6] ss:$0 sm:$0xff] }
  0x2d   :  { %2731 = vmatprep.subr.mxu0 %v74_v7  ;;  %2742 = vmatprep.subr.mxu1 %v3254_v0 }
  0x2e   :  { %2732 = vmatpush3.msra.mxu0 %v74_v7  ;;  %2743 = vmatpush3.msra.mxu1 %v3345_v10 }
  0x2f   :  { %2734 = vmatmul.mubr.msk.f32.vlgmr.msra.gmra.mxu0 %vm100_vm1, %v93_v9  ;;  %2745 = vmatmul.mubr.f32.vlgmr.msra.gmra.mxu1 %v3254_v0 }
  0x30   :  { %2747 = vmatprep.subr.mxu0 %v3254_v0  ;;  %2758 = vmatprep.subr.mxu1 %v3254_v0 }
  0x31   :  { %2755 = vmatprep.mubr.msk.f32.mxu0 %vm3255_vm0, %v3254_v0  ;;  %2766 = vmatprep.mubr.msk.f32.mxu1 %vm3255_vm0, %v3254_v0 }
  0x32   :  { %2748 = vmatpush3.msra.mxu0 %v3377_v36  ;;  %2759 = vmatpush3.msra.mxu1 %v3384_v38 }
  0x33   :  { %2749 = vmatprep.subr.mxu0 %v3254_v0  ;;  %2760 = vmatprep.subr.mxu1 %v3254_v0 }
  0x34   :  { %2750 = vmatpush3.msra.mxu0 %v3379_v37  ;;  %2761 = vmatpush3.msra.mxu1 %v3391_v39 }
  0x35   :  { %2751 = vmatprep.subr.mxu0 %v3254_v0  ;;  %2762 = vmatprep.subr.mxu1 %v3254_v0 }
  0x36   :  { %2752 = vmatpush3.msra.mxu0 %v3394_v40  ;;  %2763 = vmatpush3.msra.mxu1 %v3400_v41 }
  0x37   :  { %2753 = vmatprep.subr.mxu0 %v3254_v0  ;;  %2764 = vmatprep.subr.mxu1 %v3254_v0 }
  0x38   :  { %2754 = vmatpush3.msra.mxu0 %v3405_v42  ;;  %2765 = vmatpush3.msra.mxu1 %v3418_v44 }
  0x39   :  { %2769 = vmatprep.subr.mxu0 %v3254_v0  ;;  %2767 = vmatmul.mubr.f32.vlgmr.msra.gmra.mxu1 %v3254_v0 }
  0x3a   :  { %2780 = vmatprep.subr.mxu1 %v3254_v0  ;;  %2788 = vmatprep.mubr.msk.f32.mxu1 %vm3255_vm0, %v3254_v0 }
  0x3b   :  { %2781 = vmatpush3.msra.mxu1 %v3377_v36 }
  0x3c   :  { %2782 = vmatprep.subr.mxu1 %v3254_v0 }
  0x3d   :  { %2783 = vmatpush3.msra.mxu1 %v3379_v37 }
  0x3e   :  { %2784 = vmatprep.subr.mxu1 %v3254_v0 }
  0x3f   :  { %2785 = vmatpush3.msra.mxu1 %v3394_v40 }
  0x40   :  { %2786 = vmatprep.subr.mxu1 %v3254_v0 }
  0x41   :  { %2787 = vmatpush3.msra.mxu1 %v3405_v42 }
  0x42   :  { %2802 = vmatprep.subr.mxu1 %v3254_v0 }
  0xef   :  { %v2735_v17 = vpop.f32.mrf.mxu0  ;;  %v295_v19 = vpop.f32.mrf.mxu1 }
  0xf0   :  { %v3361_v18 = vadd.f32 %v2735_v17, %v2550_v14 }
  0xf1   :  { %v173_v20 = vpop.f32.mrf.mxu0  ;;  %v2746_v23 = vpop.f32.mrf.mxu1 }
  0xf2   :  { %v3363_v21 = vadd.f32 %v2550_v14, %v173_v20 }
  0xf4   :  { %v3369_v24 = vrot.slane %v3363_v21, %v3365_v22 }
  0xf6   :  { %v299_v25 = vadd.f32 %v295_v19, %v3369_v24  ;;  %v199_v56 = vcombine.high %v3369_v24, %v3369_v24 }
  0xf8   :  { %3022 = vtanh.f32 %v299_v25  ;;  %v2553_v27 = vmul.f32 -1.442695, %v299_v25 }
  0xf9   :  { %v478_v49 = vpop.f32.mrf.mxu1 }
  0xfa   :  { %3024 = vpow2.f32 %v2553_v27 }
  0xfb   :  { %v2768_v50 = vpop.f32.mrf.mxu1 }
 0x105   :  { %v3023_v26 = vpop.eup %3022 }
 0x106   :  { %309 = vrot.lane.b32.xlu0 %v3023_v26, %s3257_s3 }
 0x107   :  { %v3025_v28 = vpop.eup %3024 }
 0x108   :  { %v303_v29 = vadd.f32 1.0, %v3025_v28 }
 0x10a   :  { %3026 = vrcp.f32 %v303_v29 }
 0x117   :  { %v3027_v30 = vpop.eup %3026 }
 0x118   :  { %v307_v33 = vmul.f32 0.0, %v3027_v30 }
 0x178   :  { %v310_v31 = vpop.permute.xlu0 %309 }
 0x179   :  { %v312_v32 = vmul.f32 %v3027_v30, %v310_v31 }
 0x17b   :  { %314 = vrot.lane.b32.xlu0 %v312_v32, %s3258_s11 }
 0x1ed   :  { %v315_v34 = vpop.permute.xlu0 %314 }
 0x1ee   :  { %v3374_v35 = vadd.f32 %v315_v34, %v307_v33 }
 0x1f0   :  { %3028 = vtanh.f32 %v3374_v35 }
 0x1fd   :  { %v3029_v43 = vpop.eup %3028 }
 0x1fe   :  { %320 = vrot.lane.b32.xlu1 %v3029_v43, %s3257_s3 }
 0x270   :  { %v321_v45 = vpop.permute.xlu1 %320 }
 0x271   :  { %v323_v46 = vmul.f32 %v3027_v30, %v321_v45 }
 0x273   :  { %v337_v47 = vrot.slane %v323_v46, %v3365_v22  ;;  %v184_v46 = vcombine.high %v3363_v21, %v3363_v21 }
 0x275   :  { %338 = vrot.lane.b32.xlu1 %v337_v47, %s3258_s11 }
 0x2e7   :  { %v339_v48 = vpop.permute.xlu1 %338 }
 0x2e8   :  { %2756 = vmatmul.mubr.msk.f32.vlgmr.msra.gmra.mxu0 %vm100_vm1, %v339_v48 }
 0x2e9   :  { %2770 = vmatpush3.msra.mxu0 %v3328_v3  ;;  %2777 = vmatprep.mubr.msk.f32.mxu0 %vm3255_vm0, %v3254_v0 }
 0x2ea   :  { %2771 = vmatprep.subr.mxu0 %v3254_v0 }
 0x2eb   :  { %2772 = vmatpush3.msra.mxu0 %v3334_v6 }
 0x2ec   :  { %2773 = vmatprep.subr.mxu0 %v3254_v0 }
 0x2ed   :  { %2774 = vmatpush3.msra.mxu0 %v3341_v8 }
 0x2ee   :  { %2775 = vmatprep.subr.mxu0 %v3254_v0 }
 0x2ef   :  { %2776 = vmatpush3.msra.mxu0 %v3345_v10 }
 0x2f0   :  { %2778 = vmatmul.mubr.msk.f32.vlgmr.msra.gmra.mxu0 %vm100_vm1, %v339_v48  ;;  %2791 = vmatprep.subr.mxu0 %v3254_v0  ;;  %v3518_v48 = vrot.slane %v184_v46, %v3365_v22 }
 0x2f1   :  { %2792 = vmatpush3.msra.mxu0 %v3384_v38  ;;  %2799 = vmatprep.mubr.msk.f32.mxu0 %vm3255_vm0, %v3254_v0 }
 0x2f2   :  { %2793 = vmatprep.subr.mxu0 %v3254_v0 }
 0x2f3   :  { %2794 = vmatpush3.msra.mxu0 %v3391_v39 }
 0x2f4   :  { %2795 = vmatprep.subr.mxu0 %v3254_v0 }
 0x2f5   :  { %2796 = vmatpush3.msra.mxu0 %v3400_v41 }
 0x2f6   :  { %2797 = vmatprep.subr.mxu0 %v3254_v0 }
 0x2f7   :  { %2798 = vmatpush3.msra.mxu0 %v3418_v44 }
 0x2f8   :  { %2813 = vmatprep.subr.mxu0 %v3254_v0 }
 0x3a8   :  { %v408_v52 = vpop.f32.mrf.mxu0 }
 0x3a9   :  { %v409_v53 = vadd.f32 %v3460_v51, %v408_v52 }
 0x3aa   :  { %v2757_v54 = vpop.f32.mrf.mxu0 }
 0x3ab   :  { %v482_v55 = vadd.f32 %v478_v49, %v409_v53 }
 0x3ad   :  { %3030 = vtanh.f32 %v482_v55  ;;  %v2556_v62 = vmul.f32 -1.442695, %v482_v55 }
 0x3b0   :  { %v573_v57 = vpop.f32.mrf.mxu0 }
 0x3b1   :  { %v577_v58 = vadd.f32 %v573_v57, %v199_v56 }
 0x3b2   :  { %v2779_v59 = vpop.f32.mrf.mxu0 }
 0x3b3   :  { %3032 = vtanh.f32 %v577_v58  ;;  %v2558_v63 = vmul.f32 -1.442695, %v577_v58 }
 0x3b4   :  { %3034 = vpow2.f32 %v2556_v62 }
 0x3b5   :  { %3036 = vpow2.f32 %v2558_v63 }
 0x3ba   :  { %v3031_v60 = vpop.eup %3030 }
 0x3bb   :  { %492 = vrot.lane.b32.xlu1 %v3031_v60, %s3257_s3 }
 0x3c0   :  { %v3033_v61 = vpop.eup %3032 }
 0x3c1   :  { %587 = vrot.lane.b32.xlu0 %v3033_v61, %s3257_s3  ;;  %v3035_v1 = vpop.eup %3034 }
 0x3c2   :  { %v486_v2 = vadd.f32 1.0, %v3035_v1  ;;  %v3037_v4 = vpop.eup %3036 }
 0x3c3   :  { %v581_v5 = vadd.f32 1.0, %v3037_v4 }
 0x3c4   :  { %3038 = vrcp.f32 %v486_v2 }
 0x3c5   :  { %3040 = vrcp.f32 %v581_v5 }
 0x3d1   :  { %v3039_v7 = vpop.eup %3038 }
 0x3d2   :  { %v3041_v12 = vpop.eup %3040  ;;  %v490_v15 = vmul.f32 0.0, %v3039_v7 }
 0x3d3   :  { %v585_v19 = vmul.f32 %v3041_v12, %v3374_v35 }
 0x42d   :  { %v493_v9 = vpop.permute.xlu1 %492 }
 0x42e   :  { %v495_v11 = vmul.f32 %v3039_v7, %v493_v9 }
 0x430   :  { %497 = vrot.lane.b32.xlu1 %v495_v11, %s3258_s11 }
 0x433   :  { %v588_v13 = vpop.permute.xlu0 %587 }
 0x434   :  { %v590_v14 = vmul.f32 %v3041_v12, %v588_v13 }
 0x436   :  { %592 = vrot.lane.b32.xlu0 %v590_v14, %s3258_s11 }
 0x4a2   :  { %v498_v16 = vpop.permute.xlu1 %497 }
 0x4a3   :  { %v3469_v17 = vadd.f32 %v498_v16, %v490_v15 }
 0x4a5   :  { %3042 = vtanh.f32 %v3469_v17 }
 0x4a8   :  { %v593_v20 = vpop.permute.xlu0 %592 }
 0x4a9   :  { %v3473_v23 = vadd.f32 %v593_v20, %v585_v19 }
 0x4ab   :  { %3044 = vtanh.f32 %v3473_v23 }
 0x4b2   :  { %v3043_v24 = vpop.eup %3042 }
 0x4b3   :  { %503 = vrot.lane.b32.xlu1 %v3043_v24, %s3257_s3 }
 0x4b8   :  { %v3045_v25 = vpop.eup %3044 }
 0x4b9   :  { %598 = vrot.lane.b32.xlu0 %v3045_v25, %s3257_s3 }
 0x525   :  { %v504_v26 = vpop.permute.xlu1 %503 }
 0x526   :  { %v506_v27 = vmul.f32 %v3039_v7, %v504_v26 }
 0x528   :  { %685 = vrot.lane.b32.xlu1 %v506_v27, %s3258_s11 }
 0x52b   :  { %v599_v28 = vpop.permute.xlu0 %598 }
 0x52c   :  { %v601_v29 = vmul.f32 %v3041_v12, %v599_v28 }
 0x52e   :  { %v609_v30 = vrot.slane %v601_v29, %v3365_v22 }
 0x530   :  { %610 = vrot.lane.b32.xlu0 %v609_v30, %s3258_s11 }
 0x59a   :  { %v686_v31 = vpop.permute.xlu1 %685 }
 0x59b   :  { %2800 = vmatmul.mubr.msk.f32.vlgmr.msra.gmra.mxu0 %vm100_vm1, %v686_v31  ;;  %v200_v31 = vcombine.high %v3518_v48, %v3518_v48 }
 0x59c   :  { %2814 = vmatpush3.msra.mxu0 %v3377_v36  ;;  %2821 = vmatprep.mubr.msk.f32.mxu0 %vm3255_vm0, %v3254_v0 }
 0x59d   :  { %2815 = vmatprep.subr.mxu0 %v3254_v0 }
 0x59e   :  { %2816 = vmatpush3.msra.mxu0 %v3379_v37 }
 0x59f   :  { %2817 = vmatprep.subr.mxu0 %v3254_v0 }
 0x5a0   :  { %2818 = vmatpush3.msra.mxu0 %v3394_v40 }
 0x5a1   :  { %2819 = vmatprep.subr.mxu0 %v3254_v0 }
 0x5a2   :  { %v611_v32 = vpop.permute.xlu0 %610  ;;  %2820 = vmatpush3.msra.mxu0 %v3405_v42 }
 0x5a3   :  { %2789 = vmatmul.mubr.msk.f32.vlgmr.msra.gmra.mxu1 %vm100_vm1, %v611_v32  ;;  %2835 = vmatprep.subr.mxu0 %v3254_v0 }
 0x5a4   :  { %2803 = vmatpush3.msra.mxu1 %v3328_v3  ;;  %2810 = vmatprep.mubr.msk.f32.mxu1 %vm3255_vm0, %v3254_v0 }
 0x5a5   :  { %2804 = vmatprep.subr.mxu1 %v3254_v0 }
 0x5a6   :  { %2805 = vmatpush3.msra.mxu1 %v3334_v6 }
 0x5a7   :  { %2806 = vmatprep.subr.mxu1 %v3254_v0 }
 0x5a8   :  { %2807 = vmatpush3.msra.mxu1 %v3341_v8 }
 0x5a9   :  { %2808 = vmatprep.subr.mxu1 %v3254_v0 }
 0x5aa   :  { %2809 = vmatpush3.msra.mxu1 %v3345_v10 }
 0x5ab   :  { %2811 = vmatmul.mubr.msk.f32.vlgmr.msra.gmra.mxu1 %vm100_vm1, %v611_v32  ;;  %2824 = vmatprep.subr.mxu1 %v3254_v0 }
 0x5ac   :  { %2825 = vmatpush3.msra.mxu1 %v3384_v38  ;;  %2832 = vmatprep.mubr.msk.f32.mxu1 %vm3255_vm0, %v3254_v0 }
 0x5ad   :  { %2826 = vmatprep.subr.mxu1 %v3254_v0 }
 0x5ae   :  { %2827 = vmatpush3.msra.mxu1 %v3391_v39 }
 0x5af   :  { %2828 = vmatprep.subr.mxu1 %v3254_v0 }
 0x5b0   :  { %2829 = vmatpush3.msra.mxu1 %v3400_v41 }
 0x5b1   :  { %2830 = vmatprep.subr.mxu1 %v3254_v0 }
 0x5b2   :  { %2831 = vmatpush3.msra.mxu1 %v3418_v44 }
 0x5b3   :  { %2846 = vmatprep.subr.mxu1 %v3254_v0 }
 0x65b   :  { %v755_v33 = vpop.f32.mrf.mxu0 }
 0x65d   :  { %v2801_v34 = vpop.f32.mrf.mxu0 }
 0x663   :  { %v680_v35 = vpop.f32.mrf.mxu1 }
 0x664   :  { %v681_v43 = vadd.f32 %v3460_v51, %v680_v35 }
 0x665   :  { %v2790_v45 = vpop.f32.mrf.mxu1 }
 0x666   :  { %v759_v47 = vadd.f32 %v755_v33, %v681_v43 }
 0x668   :  { %3046 = vtanh.f32 %v759_v47  ;;  %v2561_v55 = vmul.f32 -1.442695, %v759_v47 }
 0x66b   :  { %v850_v49 = vpop.f32.mrf.mxu1 }
 0x66c   :  { %v854_v50 = vadd.f32 %v850_v49, %v3518_v48 }
 0x66d   :  { %v2812_v52 = vpop.f32.mrf.mxu1 }
 0x66e   :  { %3048 = vtanh.f32 %v854_v50  ;;  %v2563_v56 = vmul.f32 -1.442695, %v854_v50 }
 0x66f   :  { %3050 = vpow2.f32 %v2561_v55 }
 0x670   :  { %3052 = vpow2.f32 %v2563_v56 }
 0x675   :  { %v3047_v53 = vpop.eup %3046 }
 0x676   :  { %769 = vrot.lane.b32.xlu1 %v3047_v53, %s3257_s3 }
 0x67b   :  { %v3049_v54 = vpop.eup %3048 }
 0x67c   :  { %864 = vrot.lane.b32.xlu0 %v3049_v54, %s3257_s3  ;;  %v3051_v21 = vpop.eup %3050 }
 0x67d   :  { %v763_v57 = vadd.f32 1.0, %v3051_v21  ;;  %v3053_v58 = vpop.eup %3052 }
 0x67e   :  { %v858_v59 = vadd.f32 1.0, %v3053_v58 }
 0x67f   :  { %3054 = vrcp.f32 %v763_v57 }
 0x680   :  { %3056 = vrcp.f32 %v858_v59 }
 0x68c   :  { %v3055_v60 = vpop.eup %3054 }
 0x68d   :  { %v3057_v63 = vpop.eup %3056  ;;  %v767_v4 = vmul.f32 %v3055_v60, %v3469_v17 }
 0x68e   :  { %v862_v9 = vmul.f32 %v3057_v63, %v3473_v23 }
 0x6e8   :  { %v770_v61 = vpop.permute.xlu1 %769 }
 0x6e9   :  { %v772_v62 = vmul.f32 %v3055_v60, %v770_v61 }
 0x6eb   :  { %774 = vrot.lane.b32.xlu1 %v772_v62, %s3258_s11 }
 0x6ee   :  { %v865_v1 = vpop.permute.xlu0 %864 }
 0x6ef   :  { %v867_v2 = vmul.f32 %v3057_v63, %v865_v1 }
 0x6f1   :  { %869 = vrot.lane.b32.xlu0 %v867_v2, %s3258_s11 }
 0x75d   :  { %v775_v5 = vpop.permute.xlu1 %774 }
 0x75e   :  { %v3526_v7 = vadd.f32 %v775_v5, %v767_v4 }
 0x760   :  { %3058 = vtanh.f32 %v3526_v7 }
 0x763   :  { %v870_v11 = vpop.permute.xlu0 %869 }
 0x764   :  { %v3530_v12 = vadd.f32 %v870_v11, %v862_v9 }
 0x766   :  { %3060 = vtanh.f32 %v3530_v12 }
 0x76d   :  { %v3059_v13 = vpop.eup %3058 }
 0x76e   :  { %780 = vrot.lane.b32.xlu1 %v3059_v13, %s3257_s3 }
 0x773   :  { %v3061_v14 = vpop.eup %3060 }
 0x774   :  { %875 = vrot.lane.b32.xlu0 %v3061_v14, %s3257_s3 }
 0x7e0   :  { %v781_v15 = vpop.permute.xlu1 %780 }
 0x7e1   :  { %v783_v16 = vmul.f32 %v3055_v60, %v781_v15 }
 0x7e3   :  { %962 = vrot.lane.b32.xlu1 %v783_v16, %s3258_s11 }
 0x7e6   :  { %v876_v17 = vpop.permute.xlu0 %875 }
 0x7e7   :  { %v878_v19 = vmul.f32 %v3057_v63, %v876_v17 }
 0x7e9   :  { %v886_v20 = vrot.slane %v878_v19, %v3365_v22 }
 0x7eb   :  { %887 = vrot.lane.b32.xlu0 %v886_v20, %s3258_s11  ;;  %v3627_v20 = vrot.slane %v3361_v18, %v3365_v22 }
 0x855   :  { %v963_v23 = vpop.permute.xlu1 %962 }
 0x856   :  { %2833 = vmatmul.mubr.msk.f32.vlgmr.msra.gmra.mxu1 %vm100_vm1, %v963_v23 }
 0x857   :  { %2847 = vmatpush3.msra.mxu1 %v3377_v36  ;;  %2854 = vmatprep.mubr.msk.f32.mxu1 %vm3255_vm0, %v3254_v0 }
 0x858   :  { %2848 = vmatprep.subr.mxu1 %v3254_v0 }
 0x859   :  { %2849 = vmatpush3.msra.mxu1 %v3379_v37 }
 0x85a   :  { %2850 = vmatprep.subr.mxu1 %v3254_v0 }
 0x85b   :  { %2851 = vmatpush3.msra.mxu1 %v3394_v40 }
 0x85c   :  { %2852 = vmatprep.subr.mxu1 %v3254_v0 }
 0x85d   :  { %v888_v24 = vpop.permute.xlu0 %887  ;;  %2853 = vmatpush3.msra.mxu1 %v3405_v42 }
 0x85e   :  { %2822 = vmatmul.mubr.msk.f32.vlgmr.msra.gmra.mxu0 %vm100_vm1, %v888_v24  ;;  %2868 = vmatprep.subr.mxu1 %v3254_v0 }
 0x85f   :  { %2836 = vmatpush3.msra.mxu0 %v3328_v3  ;;  %2843 = vmatprep.mubr.msk.f32.mxu0 %vm3255_vm0, %v3254_v0 }
 0x860   :  { %2837 = vmatprep.subr.mxu0 %v3254_v0 }
 0x861   :  { %2838 = vmatpush3.msra.mxu0 %v3334_v6 }
 0x862   :  { %2839 = vmatprep.subr.mxu0 %v3254_v0 }
 0x863   :  { %2840 = vmatpush3.msra.mxu0 %v3341_v8 }
 0x864   :  { %2841 = vmatprep.subr.mxu0 %v3254_v0 }
 0x865   :  { %2842 = vmatpush3.msra.mxu0 %v3345_v10 }
 0x866   :  { %2844 = vmatmul.mubr.msk.f32.vlgmr.msra.gmra.mxu0 %vm100_vm1, %v888_v24  ;;  %2857 = vmatprep.subr.mxu0 %v3254_v0 }
 0x867   :  { %2858 = vmatpush3.msra.mxu0 %v3384_v38  ;;  %2865 = vmatprep.mubr.msk.f32.mxu0 %vm3255_vm0, %v3254_v0 }
 0x868   :  { %2859 = vmatprep.subr.mxu0 %v3254_v0 }
 0x869   :  { %2860 = vmatpush3.msra.mxu0 %v3391_v39 }
 0x86a   :  { %2861 = vmatprep.subr.mxu0 %v3254_v0 }
 0x86b   :  { %2862 = vmatpush3.msra.mxu0 %v3400_v41 }
 0x86c   :  { %2863 = vmatprep.subr.mxu0 %v3254_v0 }
 0x86d   :  { %2864 = vmatpush3.msra.mxu0 %v3418_v44 }
 0x86e   :  { %2879 = vmatprep.subr.mxu0 %v3254_v0 }
 0x916   :  { %v1032_v25 = vpop.f32.mrf.mxu1 }
 0x918   :  { %v2834_v26 = vpop.f32.mrf.mxu1 }
 0x91e   :  { %v957_v27 = vpop.f32.mrf.mxu0 }
 0x91f   :  { %v958_v28 = vadd.f32 %v3460_v51, %v957_v27 }
 0x920   :  { %v2823_v29 = vpop.f32.mrf.mxu0 }
 0x921   :  { %v1036_v30 = vadd.f32 %v1032_v25, %v958_v28 }
 0x923   :  { %3062 = vtanh.f32 %v1036_v30  ;;  %v2566_v45 = vmul.f32 -1.442695, %v1036_v30 }
 0x926   :  { %v1127_v32 = vpop.f32.mrf.mxu0 }
 0x927   :  { %v1131_v33 = vadd.f32 %v1127_v32, %v200_v31 }
 0x928   :  { %v2845_v34 = vpop.f32.mrf.mxu0 }
 0x929   :  { %3064 = vtanh.f32 %v1131_v33  ;;  %v2568_v46 = vmul.f32 -1.442695, %v1131_v33 }
 0x92a   :  { %3066 = vpow2.f32 %v2566_v45 }
 0x92b   :  { %3068 = vpow2.f32 %v2568_v46 }
 0x930   :  { %v3063_v35 = vpop.eup %3062 }
 0x931   :  { %1046 = vrot.lane.b32.xlu1 %v3063_v35, %s3257_s3 }
 0x936   :  { %v3065_v43 = vpop.eup %3064 }
 0x937   :  { %1141 = vrot.lane.b32.xlu0 %v3065_v43, %s3257_s3  ;;  %v3067_v47 = vpop.eup %3066 }
 0x938   :  { %v1040_v49 = vadd.f32 1.0, %v3067_v47  ;;  %v3069_v50 = vpop.eup %3068 }
 0x939   :  { %v1135_v52 = vadd.f32 1.0, %v3069_v50 }
 0x93a   :  { %3070 = vrcp.f32 %v1040_v49 }
 0x93b   :  { %3072 = vrcp.f32 %v1135_v52 }
 0x947   :  { %v3071_v48 = vpop.eup %3070 }
 0x948   :  { %v3073_v55 = vpop.eup %3072  ;;  %v1044_v57 = vmul.f32 %v3071_v48, %v3526_v7 }
 0x949   :  { %v1139_v60 = vmul.f32 %v3073_v55, %v3530_v12 }
 0x9a3   :  { %v1047_v53 = vpop.permute.xlu1 %1046 }
 0x9a4   :  { %v1049_v54 = vmul.f32 %v3071_v48, %v1047_v53 }
 0x9a6   :  { %1051 = vrot.lane.b32.xlu1 %v1049_v54, %s3258_s11 }
 0x9a9   :  { %v1142_v56 = vpop.permute.xlu0 %1141 }
 0x9aa   :  { %v1144_v21 = vmul.f32 %v3073_v55, %v1142_v56 }
 0x9ac   :  { %1146 = vrot.lane.b32.xlu0 %v1144_v21, %s3258_s11 }
 0xa18   :  { %v1052_v58 = vpop.permute.xlu1 %1051 }
 0xa19   :  { %v3579_v59 = vadd.f32 %v1052_v58, %v1044_v57 }
 0xa1b   :  { %3074 = vtanh.f32 %v3579_v59 }
 0xa1e   :  { %v1147_v61 = vpop.permute.xlu0 %1146 }
 0xa1f   :  { %v3583_v62 = vadd.f32 %v1147_v61, %v1139_v60 }
 0xa21   :  { %3076 = vtanh.f32 %v3583_v62 }
 0xa28   :  { %v3075_v63 = vpop.eup %3074 }
 0xa29   :  { %1057 = vrot.lane.b32.xlu1 %v3075_v63, %s3257_s3 }
 0xa2e   :  { %v3077_v1 = vpop.eup %3076 }
 0xa2f   :  { %1152 = vrot.lane.b32.xlu0 %v3077_v1, %s3257_s3 }
 0xa9b   :  { %v1058_v2 = vpop.permute.xlu1 %1057 }
 0xa9c   :  { %v1060_v4 = vmul.f32 %v3071_v48, %v1058_v2  ;;  %v216_v2 = vcombine.high %v3627_v20, %v3627_v20 }
 0xa9e   :  { %1239 = vrot.lane.b32.xlu1 %v1060_v4, %s3258_s11 }
 0xaa1   :  { %v1153_v5 = vpop.permute.xlu0 %1152 }
 0xaa2   :  { %v1155_v7 = vmul.f32 %v3073_v55, %v1153_v5 }
 0xaa4   :  { %v1163_v9 = vrot.slane %v1155_v7, %v3365_v22 }
 0xaa6   :  { %1164 = vrot.lane.b32.xlu0 %v1163_v9, %s3258_s11 }
 0xb10   :  { %v1240_v11 = vpop.permute.xlu1 %1239 }
 0xb11   :  { %2866 = vmatmul.mubr.msk.f32.vlgmr.msra.gmra.mxu0 %vm100_vm1, %v1240_v11 }
 0xb12   :  { %2880 = vmatpush3.msra.mxu0 %v3377_v36  ;;  %2887 = vmatprep.mubr.msk.f32.mxu0 %vm3255_vm0, %v3254_v0 }
 0xb13   :  { %2881 = vmatprep.subr.mxu0 %v3254_v0 }
 0xb14   :  { %2882 = vmatpush3.msra.mxu0 %v3379_v37 }
 0xb15   :  { %2883 = vmatprep.subr.mxu0 %v3254_v0 }
 0xb16   :  { %2884 = vmatpush3.msra.mxu0 %v3394_v40 }
 0xb17   :  { %2885 = vmatprep.subr.mxu0 %v3254_v0 }
 0xb18   :  { %v1165_v12 = vpop.permute.xlu0 %1164  ;;  %2886 = vmatpush3.msra.mxu0 %v3405_v42 }
 0xb19   :  { %2855 = vmatmul.mubr.msk.f32.vlgmr.msra.gmra.mxu1 %vm100_vm1, %v1165_v12  ;;  %2901 = vmatprep.subr.mxu0 %v3254_v0 }
 0xb1a   :  { %2869 = vmatpush3.msra.mxu1 %v3328_v3  ;;  %2876 = vmatprep.mubr.msk.f32.mxu1 %vm3255_vm0, %v3254_v0 }
 0xb1b   :  { %2870 = vmatprep.subr.mxu1 %v3254_v0 }
 0xb1c   :  { %2871 = vmatpush3.msra.mxu1 %v3334_v6 }
 0xb1d   :  { %2872 = vmatprep.subr.mxu1 %v3254_v0 }
 0xb1e   :  { %2873 = vmatpush3.msra.mxu1 %v3341_v8 }
 0xb1f   :  { %2874 = vmatprep.subr.mxu1 %v3254_v0 }
 0xb20   :  { %2875 = vmatpush3.msra.mxu1 %v3345_v10 }
 0xb21   :  { %2877 = vmatmul.mubr.msk.f32.vlgmr.msra.gmra.mxu1 %vm100_vm1, %v1165_v12  ;;  %2890 = vmatprep.subr.mxu1 %v3254_v0 }
 0xb22   :  { %2891 = vmatpush3.msra.mxu1 %v3384_v38  ;;  %2898 = vmatprep.mubr.msk.f32.mxu1 %vm3255_vm0, %v3254_v0 }
 0xb23   :  { %2892 = vmatprep.subr.mxu1 %v3254_v0 }
 0xb24   :  { %2893 = vmatpush3.msra.mxu1 %v3391_v39 }
 0xb25   :  { %2894 = vmatprep.subr.mxu1 %v3254_v0 }
 0xb26   :  { %2895 = vmatpush3.msra.mxu1 %v3400_v41 }
 0xb27   :  { %2896 = vmatprep.subr.mxu1 %v3254_v0 }
 0xb28   :  { %2897 = vmatpush3.msra.mxu1 %v3418_v44 }
 0xb29   :  { %2912 = vmatprep.subr.mxu1 %v3254_v0 }
 0xbd1   :  { %v1309_v13 = vpop.f32.mrf.mxu0 }
 0xbd3   :  { %v2867_v14 = vpop.f32.mrf.mxu0 }
 0xbd9   :  { %v1234_v15 = vpop.f32.mrf.mxu1 }
 0xbda   :  { %v1235_v16 = vadd.f32 %v3460_v51, %v1234_v15 }
 0xbdb   :  { %v2856_v17 = vpop.f32.mrf.mxu1 }
 0xbdc   :  { %v1313_v19 = vadd.f32 %v1309_v13, %v1235_v16 }
 0xbde   :  { %3078 = vtanh.f32 %v1313_v19  ;;  %v2571_v28 = vmul.f32 -1.442695, %v1313_v19 }
 0xbe1   :  { %v1404_v23 = vpop.f32.mrf.mxu1 }
 0xbe2   :  { %v1408_v24 = vadd.f32 %v1404_v23, %v3627_v20 }
 0xbe3   :  { %v2878_v25 = vpop.f32.mrf.mxu1 }
 0xbe4   :  { %3080 = vtanh.f32 %v1408_v24  ;;  %v2573_v29 = vmul.f32 -1.442695, %v1408_v24 }
 0xbe5   :  { %3082 = vpow2.f32 %v2571_v28 }
 0xbe6   :  { %3084 = vpow2.f32 %v2573_v29 }
 0xbeb   :  { %v3079_v26 = vpop.eup %3078 }
 0xbec   :  { %1323 = vrot.lane.b32.xlu1 %v3079_v26, %s3257_s3 }
 0xbf1   :  { %v3081_v27 = vpop.eup %3080 }
 0xbf2   :  { %1418 = vrot.lane.b32.xlu0 %v3081_v27, %s3257_s3  ;;  %v3083_v30 = vpop.eup %3082 }
 0xbf3   :  { %v1317_v31 = vadd.f32 1.0, %v3083_v30  ;;  %v3085_v32 = vpop.eup %3084 }
 0xbf4   :  { %v1412_v33 = vadd.f32 1.0, %v3085_v32 }
 0xbf5   :  { %3086 = vrcp.f32 %v1317_v31 }
 0xbf6   :  { %3088 = vrcp.f32 %v1412_v33 }
 0xc02   :  { %v3087_v34 = vpop.eup %3086 }
 0xc03   :  { %v3089_v45 = vpop.eup %3088  ;;  %v1321_v49 = vmul.f32 %v3087_v34, %v3579_v59 }
 0xc04   :  { %v1416_v48 = vmul.f32 %v3089_v45, %v3583_v62 }
 0xc5e   :  { %v1324_v35 = vpop.permute.xlu1 %1323 }
 0xc5f   :  { %v1326_v43 = vmul.f32 %v3087_v34, %v1324_v35 }
 0xc61   :  { %1328 = vrot.lane.b32.xlu1 %v1326_v43, %s3258_s11 }
 0xc64   :  { %v1419_v46 = vpop.permute.xlu0 %1418 }
 0xc65   :  { %v1421_v47 = vmul.f32 %v3089_v45, %v1419_v46 }
 0xc67   :  { %1423 = vrot.lane.b32.xlu0 %v1421_v47, %s3258_s11 }
 0xcd3   :  { %v1329_v50 = vpop.permute.xlu1 %1328 }
 0xcd4   :  { %v3635_v52 = vadd.f32 %v1329_v50, %v1321_v49 }
 0xcd6   :  { %3090 = vtanh.f32 %v3635_v52 }
 0xcd9   :  { %v1424_v53 = vpop.permute.xlu0 %1423 }
 0xcda   :  { %v3639_v54 = vadd.f32 %v1424_v53, %v1416_v48 }
 0xcdc   :  { %3092 = vtanh.f32 %v3639_v54 }
 0xce3   :  { %v3091_v55 = vpop.eup %3090 }
 0xce4   :  { %1334 = vrot.lane.b32.xlu1 %v3091_v55, %s3257_s3  ;;  %v201_v55 = vcombine.high %v3361_v18, %v3361_v18 }
 0xce9   :  { %v3093_v56 = vpop.eup %3092 }
 0xcea   :  { %1429 = vrot.lane.b32.xlu0 %v3093_v56, %s3257_s3  ;;  %v3745_v56 = vrot.slane %v201_v55, %v3365_v22 }
 0xd56   :  { %v1335_v21 = vpop.permute.xlu1 %1334 }
 0xd57   :  { %v1337_v57 = vmul.f32 %v3087_v34, %v1335_v21 }
 0xd59   :  { %1516 = vrot.lane.b32.xlu1 %v1337_v57, %s3258_s11 }
 0xd5c   :  { %v1430_v58 = vpop.permute.xlu0 %1429 }
 0xd5d   :  { %v1432_v59 = vmul.f32 %v3089_v45, %v1430_v58 }
 0xd5f   :  { %v1440_v60 = vrot.slane %v1432_v59, %v3365_v22 }
 0xd61   :  { %1441 = vrot.lane.b32.xlu0 %v1440_v60, %s3258_s11 }
 0xdcb   :  { %v1517_v61 = vpop.permute.xlu1 %1516 }
 0xdcc   :  { %2899 = vmatmul.mubr.msk.f32.vlgmr.msra.gmra.mxu1 %vm100_vm1, %v1517_v61 }
 0xdcd   :  { %2913 = vmatpush3.msra.mxu1 %v3377_v36  ;;  %2920 = vmatprep.mubr.msk.f32.mxu1 %vm3255_vm0, %v3254_v0 }
 0xdce   :  { %2914 = vmatprep.subr.mxu1 %v3254_v0 }
 0xdcf   :  { %2915 = vmatpush3.msra.mxu1 %v3379_v37 }
 0xdd0   :  { %2916 = vmatprep.subr.mxu1 %v3254_v0 }
 0xdd1   :  { %2917 = vmatpush3.msra.mxu1 %v3394_v40 }
 0xdd2   :  { %2918 = vmatprep.subr.mxu1 %v3254_v0 }
 0xdd3   :  { %v1442_v62 = vpop.permute.xlu0 %1441  ;;  %2919 = vmatpush3.msra.mxu1 %v3405_v42 }
 0xdd4   :  { %2888 = vmatmul.mubr.msk.f32.vlgmr.msra.gmra.mxu0 %vm100_vm1, %v1442_v62  ;;  %2934 = vmatprep.subr.mxu1 %v3254_v0 }
 0xdd5   :  { %2902 = vmatpush3.msra.mxu0 %v3328_v3  ;;  %2909 = vmatprep.mubr.msk.f32.mxu0 %vm3255_vm0, %v3254_v0 }
 0xdd6   :  { %2903 = vmatprep.subr.mxu0 %v3254_v0 }
 0xdd7   :  { %2904 = vmatpush3.msra.mxu0 %v3334_v6 }
 0xdd8   :  { %2905 = vmatprep.subr.mxu0 %v3254_v0 }
 0xdd9   :  { %2906 = vmatpush3.msra.mxu0 %v3341_v8 }
 0xdda   :  { %2907 = vmatprep.subr.mxu0 %v3254_v0 }
 0xddb   :  { %2908 = vmatpush3.msra.mxu0 %v3345_v10 }
 0xddc   :  { %2910 = vmatmul.mubr.msk.f32.vlgmr.msra.gmra.mxu0 %vm100_vm1, %v1442_v62  ;;  %2923 = vmatprep.subr.mxu0 %v3254_v0 }
 0xddd   :  { %2924 = vmatpush3.msra.mxu0 %v3384_v38  ;;  %2931 = vmatprep.mubr.msk.f32.mxu0 %vm3255_vm0, %v3254_v0 }
 0xdde   :  { %2925 = vmatprep.subr.mxu0 %v3254_v0 }
 0xddf   :  { %2926 = vmatpush3.msra.mxu0 %v3391_v39 }
 0xde0   :  { %2927 = vmatprep.subr.mxu0 %v3254_v0 }
 0xde1   :  { %2928 = vmatpush3.msra.mxu0 %v3400_v41 }
 0xde2   :  { %2929 = vmatprep.subr.mxu0 %v3254_v0 }
 0xde3   :  { %2930 = vmatpush3.msra.mxu0 %v3418_v44 }
 0xde4   :  { %2945 = vmatprep.subr.mxu0 %v3254_v0 }
 0xe8c   :  { %v1586_v3 = vpop.f32.mrf.mxu1 }
 0xe8e   :  { %v2900_v6 = vpop.f32.mrf.mxu1 }
 0xe94   :  { %v1511_v8 = vpop.f32.mrf.mxu0 }
 0xe95   :  { %v1512_v10 = vadd.f32 %v3460_v51, %v1511_v8 }
 0xe96   :  { %v2889_v63 = vpop.f32.mrf.mxu0 }
 0xe97   :  { %v1590_v1 = vadd.f32 %v1586_v3, %v1512_v10 }
 0xe99   :  { %3094 = vtanh.f32 %v1590_v1  ;;  %v2576_v12 = vmul.f32 -1.442695, %v1590_v1 }
 0xe9c   :  { %v1681_v4 = vpop.f32.mrf.mxu0 }
 0xe9d   :  { %v1685_v5 = vadd.f32 %v1681_v4, %v216_v2 }
 0xe9e   :  { %v2911_v7 = vpop.f32.mrf.mxu0 }
 0xe9f   :  { %3096 = vtanh.f32 %v1685_v5  ;;  %v2578_v13 = vmul.f32 -1.442695, %v1685_v5 }
 0xea0   :  { %3098 = vpow2.f32 %v2576_v12 }
 0xea1   :  { %3100 = vpow2.f32 %v2578_v13 }
 0xea6   :  { %v3095_v9 = vpop.eup %3094 }
 0xea7   :  { %1600 = vrot.lane.b32.xlu1 %v3095_v9, %s3257_s3 }
 0xeac   :  { %v3097_v11 = vpop.eup %3096 }
 0xead   :  { %1695 = vrot.lane.b32.xlu0 %v3097_v11, %s3257_s3  ;;  %v3099_v14 = vpop.eup %3098 }
 0xeae   :  { %v1594_v15 = vadd.f32 1.0, %v3099_v14  ;;  %v3101_v16 = vpop.eup %3100 }
 0xeaf   :  { %v1689_v17 = vadd.f32 1.0, %v3101_v16 }
 0xeb0   :  { %3102 = vrcp.f32 %v1594_v15 }
 0xeb1   :  { %3104 = vrcp.f32 %v1689_v17 }
 0xebd   :  { %v3103_v19 = vpop.eup %3102 }
 0xebe   :  { %v3105_v24 = vpop.eup %3104  ;;  %v1598_v27 = vmul.f32 %v3103_v19, %v3635_v52 }
 0xebf   :  { %v1693_v30 = vmul.f32 %v3105_v24, %v3639_v54 }
 0xf19   :  { %v1601_v20 = vpop.permute.xlu1 %1600 }
 0xf1a   :  { %v1603_v23 = vmul.f32 %v3103_v19, %v1601_v20 }
 0xf1c   :  { %1605 = vrot.lane.b32.xlu1 %v1603_v23, %s3258_s11  ;;  %v3154_v23 = vld [vmem:[#allocation7 + $0x18] sm:$0xff] }
 0xf1f   :  { %v1696_v25 = vpop.permute.xlu0 %1695 }
 0xf20   :  { %v1698_v26 = vmul.f32 %v3105_v24, %v1696_v25  ;;  %v3156_v25 = vld [vmem:[#allocation7 + $0x8] sm:$0xff] }
 0xf22   :  { %1700 = vrot.lane.b32.xlu0 %v1698_v26, %s3258_s11 }
 0xf8e   :  { %v1606_v28 = vpop.permute.xlu1 %1605 }
 0xf8f   :  { %v3688_v29 = vadd.f32 %v1606_v28, %v1598_v27  ;;  %v3157_v27 = vld [vmem:[#allocation7] sm:$0xff]  ;;  %v3158_v28 = vld [vmem:[%s3852_s5 + $0x18] sm:$0xff] }
 0xf91   :  { %3106 = vtanh.f32 %v3688_v29 }
 0xf94   :  { %v1701_v31 = vpop.permute.xlu0 %1700 }
 0xf95   :  { %v3692_v32 = vadd.f32 %v1701_v31, %v1693_v30  ;;  %v3160_v30 = vld [vmem:[%s3852_s5 + $0x8] sm:$0xff]  ;;  %v3161_v31 = vld [vmem:[%s3852_s5] sm:$0xff] }
 0xf97   :  { %3108 = vtanh.f32 %v3692_v32 }
 0xf9e   :  { %v3107_v33 = vpop.eup %3106 }
 0xf9f   :  { %1611 = vrot.lane.b32.xlu1 %v3107_v33, %s3257_s3 }
 0xfa4   :  { %v3109_v34 = vpop.eup %3108 }
 0xfa5   :  { %1706 = vrot.lane.b32.xlu0 %v3109_v34, %s3257_s3 }
0x1011   :  { %v1612_v35 = vpop.permute.xlu1 %1611 }
0x1012   :  { %v1614_v43 = vmul.f32 %v3103_v19, %v1612_v35  ;;  %v3162_v35 = vld [vmem:[%s3853_s6] ss:$0 sm:$0xff] }
0x1014   :  { %1793 = vrot.lane.b32.xlu1 %v1614_v43, %s3258_s11 }
0x1017   :  { %v1707_v45 = vpop.permute.xlu0 %1706 }
0x1018   :  { %v1709_v46 = vmul.f32 %v3105_v24, %v1707_v45  ;;  %v3155_v24 = vld [vmem:[#allocation7 + $0x10] sm:$0xff] }
0x101a   :  { %v1717_v47 = vrot.slane %v1709_v46, %v3365_v22 }
0x101c   :  { %1718 = vrot.lane.b32.xlu0 %v1717_v47, %s3258_s11  ;;  %v217_v47 = vcombine.high %v3745_v56, %v3745_v56 }
0x1086   :  { %v1794_v49 = vpop.permute.xlu1 %1793 }
0x1087   :  { %2932 = vmatmul.mubr.msk.f32.vlgmr.msra.gmra.mxu0 %vm100_vm1, %v1794_v49 }
0x1088   :  { %2946 = vmatpush3.msra.mxu0 %v3377_v36  ;;  %2953 = vmatprep.mubr.msk.f32.mxu0 %vm3255_vm0, %v3254_v0  ;;  %v3712_v36 = vld [vmem:[#allocation5 + $0x18] sm:$0xff] }
0x1089   :  { %2947 = vmatprep.subr.mxu0 %v3254_v0 }
0x108a   :  { %2948 = vmatpush3.msra.mxu0 %v3379_v37  ;;  %v3718_v37 = vld [vmem:[#allocation5 + $0x10] sm:$0xff] }
0x108b   :  { %2949 = vmatprep.subr.mxu0 %v3254_v0 }
0x108c   :  { %2950 = vmatpush3.msra.mxu0 %v3394_v40  ;;  %v3722_v40 = vld [vmem:[#allocation5 + $0x8] sm:$0xff] }
0x108d   :  { %2951 = vmatprep.subr.mxu0 %v3254_v0 }
0x108e   :  { %v1719_v50 = vpop.permute.xlu0 %1718  ;;  %2952 = vmatpush3.msra.mxu0 %v3405_v42  ;;  %v3726_v42 = vld [vmem:[#allocation5] sm:$0xff] }
0x108f   :  { %2921 = vmatmul.mubr.msk.f32.vlgmr.msra.gmra.mxu1 %vm100_vm1, %v1719_v50  ;;  %2967 = vmatprep.subr.mxu0 %v3254_v0 }
0x1090   :  { %2935 = vmatpush3.msra.mxu1 %v3712_v36  ;;  %2942 = vmatprep.mubr.msk.f32.mxu1 %vm3255_vm0, %v3254_v0 }
0x1091   :  { %2936 = vmatprep.subr.mxu1 %v3254_v0 }
0x1092   :  { %2937 = vmatpush3.msra.mxu1 %v3718_v37 }
0x1093   :  { %2938 = vmatprep.subr.mxu1 %v3254_v0 }
0x1094   :  { %2939 = vmatpush3.msra.mxu1 %v3722_v40 }
0x1095   :  { %2940 = vmatprep.subr.mxu1 %v3254_v0 }
0x1096   :  { %2941 = vmatpush3.msra.mxu1 %v3726_v42 }
0x1097   :  { %2943 = vmatmul.mubr.msk.f32.vlgmr.msra.gmra.mxu1 %vm100_vm1, %v1719_v50  ;;  %2956 = vmatprep.subr.mxu1 %v3254_v0 }
0x1098   :  { %2957 = vmatpush3.msra.mxu1 %v3384_v38  ;;  %2964 = vmatprep.mubr.msk.f32.mxu1 %vm3255_vm0, %v3254_v0 }
0x1099   :  { %2958 = vmatprep.subr.mxu1 %v3254_v0 }
0x109a   :  { %2959 = vmatpush3.msra.mxu1 %v3391_v39 }
0x109b   :  { %2960 = vmatprep.subr.mxu1 %v3254_v0 }
0x109c   :  { %2961 = vmatpush3.msra.mxu1 %v3400_v41 }
0x109d   :  { %2962 = vmatprep.subr.mxu1 %v3254_v0 }
0x109e   :  { %2963 = vmatpush3.msra.mxu1 %v3418_v44 }
0x109f   :  { %2978 = vmatprep.subr.mxu1 %v3254_v0 }
0x1147   :  { %v1863_v52 = vpop.f32.mrf.mxu0 }
0x1149   :  { %v2933_v48 = vpop.f32.mrf.mxu0 }
0x114f   :  { %v1788_v38 = vpop.f32.mrf.mxu1 }
0x1150   :  { %v1789_v53 = vadd.f32 %v3460_v51, %v1788_v38 }
0x1151   :  { %v2922_v54 = vpop.f32.mrf.mxu1 }
0x1152   :  { %v1867_v39 = vadd.f32 %v1863_v52, %v1789_v53 }
0x1154   :  { %3110 = vtanh.f32 %v1867_v39  ;;  %v2581_v51 = vmul.f32 -1.442695, %v1867_v39 }
0x1157   :  { %v1958_v41 = vpop.f32.mrf.mxu1 }
0x1158   :  { %v1962_v21 = vadd.f32 %v1958_v41, %v3745_v56 }
0x1159   :  { %v2944_v44 = vpop.f32.mrf.mxu1 }
0x115a   :  { %3112 = vtanh.f32 %v1962_v21  ;;  %v2583_v59 = vmul.f32 -1.442695, %v1962_v21 }
0x115b   :  { %3114 = vpow2.f32 %v2581_v51 }
0x115c   :  { %3116 = vpow2.f32 %v2583_v59 }
0x1161   :  { %v3111_v57 = vpop.eup %3110 }
0x1162   :  { %1877 = vrot.lane.b32.xlu1 %v3111_v57, %s3257_s3 }
0x1167   :  { %v3113_v58 = vpop.eup %3112 }
0x1168   :  { %1972 = vrot.lane.b32.xlu0 %v3113_v58, %s3257_s3  ;;  %v3115_v18 = vpop.eup %3114 }
0x1169   :  { %v1871_v60 = vadd.f32 1.0, %v3115_v18  ;;  %v3117_v61 = vpop.eup %3116 }
0x116a   :  { %v1966_v62 = vadd.f32 1.0, %v3117_v61 }
0x116b   :  { %3118 = vrcp.f32 %v1871_v60 }
0x116c   :  { %3120 = vrcp.f32 %v1966_v62 }
0x1178   :  { %v3119_v3 = vpop.eup %3118 }
0x1179   :  { %v3121_v10 = vpop.eup %3120  ;;  %v1875_v2 = vmul.f32 %v3119_v3, %v3688_v29  ;;  %v3159_v29 = vld [vmem:[%s3852_s5 + $0x10] sm:$0xff] }
0x117a   :  { %v1970_v7 = vmul.f32 %v3121_v10, %v3692_v32 }
0x11d4   :  { %v1878_v6 = vpop.permute.xlu1 %1877 }
0x11d5   :  { %v1880_v8 = vmul.f32 %v3119_v3, %v1878_v6 }
0x11d7   :  { %1882 = vrot.lane.b32.xlu1 %v1880_v8, %s3258_s11 }
0x11da   :  { %v1973_v63 = vpop.permute.xlu0 %1972 }
0x11db   :  { %v1975_v1 = vmul.f32 %v3121_v10, %v1973_v63 }
0x11dd   :  { %1977 = vrot.lane.b32.xlu0 %v1975_v1, %s3258_s11 }
0x1249   :  { %v1883_v4 = vpop.permute.xlu1 %1882 }
0x124a   :  { %v3753_v5 = vadd.f32 %v1883_v4, %v1875_v2 }
0x124c   :  { %3122 = vtanh.f32 %v3753_v5 }
0x124f   :  { %v1978_v9 = vpop.permute.xlu0 %1977 }
0x1250   :  { %v3757_v11 = vadd.f32 %v1978_v9, %v1970_v7 }
0x1252   :  { %3124 = vtanh.f32 %v3757_v11 }
0x1259   :  { %v3123_v12 = vpop.eup %3122 }
0x125a   :  { %1888 = vrot.lane.b32.xlu1 %v3123_v12, %s3257_s3 }
0x125f   :  { %v3125_v13 = vpop.eup %3124 }
0x1260   :  { %1983 = vrot.lane.b32.xlu0 %v3125_v13, %s3257_s3 }
0x12cc   :  { %v1889_v14 = vpop.permute.xlu1 %1888 }
0x12cd   :  { %v1891_v15 = vmul.f32 %v3119_v3, %v1889_v14 }
0x12cf   :  { %2070 = vrot.lane.b32.xlu1 %v1891_v15, %s3258_s11 }
0x12d2   :  { %v1984_v16 = vpop.permute.xlu0 %1983 }
0x12d3   :  { %v1986_v17 = vmul.f32 %v3121_v10, %v1984_v16 }
0x12d5   :  { %v1994_v19 = vrot.slane %v1986_v17, %v3365_v22 }
0x12d7   :  { %1995 = vrot.lane.b32.xlu0 %v1994_v19, %s3258_s11 }
0x1341   :  { %v2071_v20 = vpop.permute.xlu1 %2070 }
0x1342   :  { %2965 = vmatmul.mubr.msk.f32.vlgmr.msra.gmra.mxu1 %vm100_vm1, %v2071_v20 }
0x1343   :  { %2979 = vmatpush3.msra.mxu1 %v3154_v23  ;;  %2986 = vmatprep.mubr.msk.f32.mxu1 %vm3255_vm0, %v3254_v0 }
0x1344   :  { %2980 = vmatprep.subr.mxu1 %v3254_v0 }
0x1345   :  { %2981 = vmatpush3.msra.mxu1 %v3155_v24 }
0x1346   :  { %2982 = vmatprep.subr.mxu1 %v3254_v0 }
0x1347   :  { %2983 = vmatpush3.msra.mxu1 %v3156_v25  ;;  %v2449_v25 = vld [vmem:[%s3854_s7 + $0x18] sm:$0xff] }
0x1348   :  { %2984 = vmatprep.subr.mxu1 %v3254_v0 }
0x1349   :  { %v1996_v26 = vpop.permute.xlu0 %1995  ;;  %2985 = vmatpush3.msra.mxu1 %v3157_v27  ;;  %v2447_v27 = vld [vmem:[%s3854_s7 + $0x8] sm:$0xff] }
0x134a   :  { %2954 = vmatmul.mubr.msk.f32.vlgmr.msra.gmra.mxu0 %vm100_vm1, %v1996_v26  ;;  %3000 = vmatprep.subr.mxu1 %v3254_v0 }
0x134b   :  { %2968 = vmatpush3.msra.mxu0 %v3712_v36  ;;  %2975 = vmatprep.mubr.msk.f32.mxu0 %vm3255_vm0, %v3254_v0 }
0x134c   :  { %2969 = vmatprep.subr.mxu0 %v3254_v0 }
0x134d   :  { %2970 = vmatpush3.msra.mxu0 %v3718_v37 }
0x134e   :  { %2971 = vmatprep.subr.mxu0 %v3254_v0 }
0x134f   :  { %2972 = vmatpush3.msra.mxu0 %v3722_v40 }
0x1350   :  { %2973 = vmatprep.subr.mxu0 %v3254_v0 }
0x1351   :  { %2974 = vmatpush3.msra.mxu0 %v3726_v42 }
0x1352   :  { %2976 = vmatmul.mubr.msk.f32.vlgmr.msra.gmra.mxu0 %vm100_vm1, %v1996_v26  ;;  %2989 = vmatprep.subr.mxu0 %v3254_v0  ;;  %v2448_v26 = vld [vmem:[%s3854_s7 + $0x10] sm:$0xff] }
0x1353   :  { %2990 = vmatpush3.msra.mxu0 %v3158_v28  ;;  %2997 = vmatprep.mubr.msk.f32.mxu0 %vm3255_vm0, %v3254_v0  ;;  %v2446_v28 = vld [vmem:[%s3854_s7] sm:$0xff]  ;;  %s2540_s7 = sshll.u32 %s3259_s16, 4  ;;  %s2541_s7 = int_to_ptr.vmem [resolvable:$true] %s2540_s7 }
0x1354   :  { %2991 = vmatprep.subr.mxu0 %v3254_v0  ;;  %p3228_p2 = scmp.lt.s32.totalorder %s2541_s7, %s2541_s7 }
0x1355   :  { %2992 = vmatpush3.msra.mxu0 %v3159_v29 }
0x1356   :  { %2993 = vmatprep.subr.mxu0 %v3254_v0 }
0x1357   :  { %2994 = vmatpush3.msra.mxu0 %v3160_v30 }
0x1358   :  { %2995 = vmatprep.subr.mxu0 %v3254_v0 }
0x1359   :  { %2996 = vmatpush3.msra.mxu0 %v3161_v31 }
0x1402   :  { %v2140_v32 = vpop.f32.mrf.mxu1 }
0x1404   :  { %v2966_v33 = vpop.f32.mrf.mxu1 }
0x1405   :  { %v2592_v33 = vld [vmem:[%s3855_s8] ss:$0 sm:$0xff] }
0x140a   :  { %v2065_v34 = vpop.f32.mrf.mxu0 }
0x140b   :  { %v2066_v43 = vadd.f32 %v3162_v35, %v2065_v34 }
0x140c   :  { %v2955_v45 = vpop.f32.mrf.mxu0 }
0x140d   :  { %v2144_v46 = vadd.f32 %v2140_v32, %v2066_v43 }
0x140f   :  { %3126 = vtanh.f32 %v2144_v46  ;;  %v2586_v42 = vmul.f32 -1.442695, %v2144_v46 }
0x1412   :  { %v2235_v49 = vpop.f32.mrf.mxu0 }
0x1413   :  { %v2239_v50 = vadd.f32 %v2235_v49, %v217_v47 }
0x1414   :  { %v2977_v36 = vpop.f32.mrf.mxu0 }
0x1415   :  { %3128 = vtanh.f32 %v2239_v50  ;;  %v2588_v52 = vmul.f32 -1.442695, %v2239_v50 }
0x1416   :  { %3130 = vpow2.f32 %v2586_v42 }
0x1417   :  { %3132 = vpow2.f32 %v2588_v52 }
0x141c   :  { %v3127_v37 = vpop.eup %3126 }
0x141d   :  { %2154 = vrot.lane.b32.xlu1 %v3127_v37, %s3257_s3 }
0x1422   :  { %v3129_v40 = vpop.eup %3128 }
0x1423   :  { %2249 = vrot.lane.b32.xlu0 %v3129_v40, %s3257_s3  ;;  %v3131_v48 = vpop.eup %3130 }
0x1424   :  { %v2148_v38 = vadd.f32 1.0, %v3131_v48  ;;  %v3133_v53 = vpop.eup %3132 }
0x1425   :  { %v2243_v54 = vadd.f32 1.0, %v3133_v53 }
0x1426   :  { %3134 = vrcp.f32 %v2148_v38 }
0x1427   :  { %3136 = vrcp.f32 %v2243_v54 }
0x1433   :  { %v3135_v55 = vpop.eup %3134 }
0x1434   :  { %v3137_v41 = vpop.eup %3136  ;;  %v2152_v57 = vmul.f32 %v3135_v55, %v3753_v5 }
0x1435   :  { %v2247_v59 = vmul.f32 %v3137_v41, %v3757_v11 }
0x148f   :  { %v2155_v39 = vpop.permute.xlu1 %2154 }
0x1490   :  { %v2157_v56 = vmul.f32 %v3135_v55, %v2155_v39 }
0x1492   :  { %2159 = vrot.lane.b32.xlu1 %v2157_v56, %s3258_s11 }
0x1495   :  { %v2250_v21 = vpop.permute.xlu0 %2249 }
0x1496   :  { %v2252_v44 = vmul.f32 %v3137_v41, %v2250_v21 }
0x1498   :  { %2254 = vrot.lane.b32.xlu0 %v2252_v44, %s3258_s11 }
0x1504   :  { %v2160_v58 = vpop.permute.xlu1 %2159 }
0x1505   :  { %v2162_v51 = vadd.f32 %v2160_v58, %v2152_v57 }
0x1507   :  { %3138 = vtanh.f32 %v2162_v51 }
0x150a   :  { %v2255_v18 = vpop.permute.xlu0 %2254 }
0x150b   :  { %v2257_v60 = vadd.f32 %v2255_v18, %v2247_v59 }
0x150d   :  { %3140 = vtanh.f32 %v2257_v60 }
0x1514   :  { %v3139_v61 = vpop.eup %3138 }
0x1515   :  { %2165 = vrot.lane.b32.xlu1 %v3139_v61, %s3257_s3 }
0x151a   :  { %v3141_v62 = vpop.eup %3140 }
0x151b   :  { %2260 = vrot.lane.b32.xlu0 %v3141_v62, %s3257_s3 }
0x1587   :  { %v2166_v3 = vpop.permute.xlu1 %2165 }
0x1588   :  { %v2168_v6 = vmul.f32 %v3135_v55, %v2166_v3 }
0x158a   :  { %2347 = vrot.lane.b32.xlu1 %v2168_v6, %s3258_s11 }
0x158d   :  { %v2261_v8 = vpop.permute.xlu0 %2260 }
0x158e   :  { %v2263_v10 = vmul.f32 %v3137_v41, %v2261_v8 }
0x1590   :  { %v2271_v63 = vrot.slane %v2263_v10, %v3365_v22 }
0x1592   :  { %2272 = vrot.lane.b32.xlu0 %v2271_v63, %s3258_s11 }
0x15fc   :  { %v2348_v1 = vpop.permute.xlu1 %2347 }
0x15fd   :  { %2998 = vmatmul.mubr.msk.f32.vlgmr.msra.gmra.mxu0 %vm100_vm1, %v2348_v1 }
0x1604   :  { %v2273_v2 = vpop.permute.xlu0 %2272 }
0x1605   :  { %2987 = vmatmul.mubr.msk.f32.vlgmr.msra.gmra.mxu1 %vm100_vm1, %v2273_v2 }
0x1606   :  { %3008 = vmatprep.mubr.msk.f32.mxu1 %vm3255_vm0, %v3254_v0  ;;  %3001 = vmatpush3.msra.mxu1 %v2449_v25 }
0x1607   :  { %3002 = vmatprep.subr.mxu1 %v3254_v0 }
0x1608   :  { %3003 = vmatpush3.msra.mxu1 %v2448_v26 }
0x1609   :  { %3004 = vmatprep.subr.mxu1 %v3254_v0 }
0x160a   :  { %3005 = vmatpush3.msra.mxu1 %v2447_v27 }
0x160b   :  { %3006 = vmatprep.subr.mxu1 %v3254_v0 }
0x160c   :  { %3007 = vmatpush3.msra.mxu1 %v2446_v28 }
0x16bd   :  { %v2417_v4 = vpop.f32.mrf.mxu0 }
0x16bf   :  { %v2999_v5 = vpop.f32.mrf.mxu0 }
0x16c5   :  { %v2342_v7 = vpop.f32.mrf.mxu1 }
0x16c6   :  { %v2343_v9 = vadd.f32 %v3162_v35, %v2342_v7 }
0x16c7   :  { %v2988_v11 = vpop.f32.mrf.mxu1 }
0x16c8   :  { %v2421_v12 = vadd.f32 %v2417_v4, %v2343_v9 }
0x16ca   :  { %3142 = vtanh.f32 %v2421_v12  ;;  %v2591_v22 = vmul.f32 -1.442695, %v2421_v12 }
0x16cc   :  { %3144 = vpow2.f32 %v2591_v22 }
0x16d7   :  { %v3143_v13 = vpop.eup %3142 }
0x16d8   :  { %2431 = vrot.lane.b32.xlu0 %v3143_v13, %s3257_s3 }
0x16d9   :  { %v3145_v14 = vpop.eup %3144 }
0x16da   :  { %v2425_v15 = vadd.f32 1.0, %v3145_v14 }
0x16dc   :  { %3146 = vrcp.f32 %v2425_v15 }
0x16e9   :  { %v3147_v16 = vpop.eup %3146 }
0x16ea   :  { %v2429_v20 = vmul.f32 %v3147_v16, %v2162_v51 }
0x174a   :  { %v2432_v17 = vpop.permute.xlu0 %2431 }
0x174b   :  { %v2434_v19 = vmul.f32 %v3147_v16, %v2432_v17 }
0x174d   :  { %2436 = vrot.lane.b32.xlu1 %v2434_v19, %s3258_s11 }
0x17bf   :  { %v2437_v23 = vpop.permute.xlu1 %2436 }
0x17c0   :  { %v2439_v24 = vadd.f32 %v2437_v23, %v2429_v20 }
0x17c2   :  { %3148 = vtanh.f32 %v2439_v24 }
0x17cf   :  { %v3149_v29 = vpop.eup %3148 }
0x17d0   :  { %2442 = vrot.lane.b32.xlu0 %v3149_v29, %s3257_s3  ;;  %s3223_s3 = scalar_lea.vmem %s2541_s7, 32 }
0x17d1   :  { %p3224_p1 = scmp.ne.s32.totalorder %s2541_s7, %s3223_s3  ;;  %p3229_p3 = scmp.lt.s32.totalorder %s3223_s3, %s3223_s3 }
0x17d3   :  { %p3230_p4 = por %p3229_p3, %p3228_p2 }
0x17d5   :  { %p3231_p5 = pnand %p3230_p4, %p3224_p1 }
0x1842   :  { %v2443_v30 = vpop.permute.xlu0 %2442 }
0x1843   :  { %v2445_v31 = vmul.f32 %v3147_v16, %v2443_v30 }
0x1845   :  { %2458 = vrot.lane.b32.xlu1 %v2445_v31, %s3258_s11 }
0x18b7   :  { %v2459_v32 = vpop.permute.xlu1 %2458 }
0x18b8   :  { %3009 = vmatmul.mubr.msk.f32.vlgmr.msra.gmra.mxu1 %vm100_vm1, %v2459_v32 }
0x1978   :  { %v2528_v34 = vpop.f32.mrf.mxu1 }
0x1979   :  { %v2529_v0 = vadd.f32 %v2592_v33, %v2528_v34 }
0x197a   :  { %v3010_v35 = vpop.f32.mrf.mxu1 }
0x197b   :  { %2533 = vst.msk [vmem:[#allocation8] sm:$0x3] %vm2532_vm2, %v2529_v0 }
0x197c   :  { %3234 = shalt.err (!%p3231_p5)
}
0x197d   :  { %2543 = dma.vmem_to_hbm [thread:$0]  %s2541_s7, 32, %s3856_s9, [#allocation4]  }
0x197e   :  { %3247 = dma.done.wait [#allocation4], 32  }
0x197f   :  { %3248 = vsyncadd [#allocation4], 4294967264 }
0x1980   :  { %2547 = vsyncpa [#allocation3], 1 }
0x1981   :  { %2548 = vsyncpa [#allocation6], 1 }
0x1982   :  { %2549 = vsyncpa [#allocation4], 1 }

</bundles_post_ra>
